<compile_context>
chip_gen: v6e
topology: v6e:2x2x1
jax: 0.10.0
libtpu: 0.0.40
codegen_flags: <defaults>
</compile_context>

<pallas_src>
import functools

import jax
import jax.numpy as jnp
from jax import lax
from jax.experimental import pallas as pl
from jax.experimental.pallas import tpu as pltpu

BN_EPS = 1e-5
PAD = 128  # lane-padded feature width (one vreg row of lanes)


# ----------------------------------------------------------------------------
# Fused Pallas kernel: whole network in one call
# ----------------------------------------------------------------------------
def _softmax_masked(logits, n_valid):
    """Row-wise softmax over the first `n_valid` lanes; padded lanes -> 0."""
    lane = lax.broadcasted_iota(jnp.int32, logits.shape, 1)
    masked = jnp.where(lane < n_valid, logits, -jnp.inf)
    m = jnp.max(masked, axis=-1, keepdims=True)
    e = jnp.exp(masked - m)                      # exp(-inf) = 0 for padded lanes
    denom = jnp.sum(e, axis=-1, keepdims=True)
    return e * pl.reciprocal(denom, approx=True)  # EUP vrcp slot, off the VALU


def deep_insertion_kernel(x_ref, w_hbm, b_ref, v1_ref, v2_ref, w_buf, sem, *,
                          n_fc1, n_fc2, enc_in, fc1_out, fc2_out):
    """Straight-line fused forward pass; all activations live in vregs.

    Weight stack (HBM, bf16, all (PAD, PAD), BN folded in):
        [0]                 encoder
        [1 .. n_fc1]        fc1 layers
        [n_fc1+1]           fc2 layer 0, rows acting on v
        [n_fc1+2]           fc2 layer 0, rows acting on v1
        [n_fc1+3 ..]        fc2 layers 1 .. n_fc2-1
    Bias stack (VMEM, f32, (n_b, PAD)):
        [0] encoder, [1..n_fc1] fc1, [n_fc1+1 ..] fc2

    The weight stack is streamed slab-by-slab into a 2-deep VMEM double buffer:
    while layer i computes, layer i+1's slab is DMA'd in.
    """
    n_w = 1 + n_fc1 + 1 + n_fc2

    def wcopy(s, slot):
        return pltpu.make_async_copy(w_hbm.at[s], w_buf.at[slot], sem.at[slot])

    # Prime the pipeline with the encoder slab.
    wcopy(0, 0).start()
    step = [0]  # trace-time counter over weight slabs

    def next_w():
        """Wait for slab `step`, kick off slab `step+1`, return slab value."""
        s = step[0]
        slot = s % 2
        wcopy(s, slot).wait()
        if s + 1 < n_w:
            wcopy(s + 1, (s + 1) % 2).start()
        step[0] = s + 1
        # Load now (before the slot can be overwritten two steps later).
        return w_buf[slot]                       # (PAD, PAD) bf16

    def dot_bf16(h, w):
        # bf16 operands -> native MXU pass; accumulate in f32.
        return jnp.dot(h.astype(jnp.bfloat16), w,
                       preferred_element_type=jnp.float32)

    # --- encoder1: Linear (+ folded BN) + ReLU ------------------------------
    w0 = next_w()
    v = jnp.maximum(dot_bf16(x_ref[...], w0[:enc_in, :]) + b_ref[0:1, :], 0.0)

    # --- fc1 head: 4 x (Linear+BN+ReLU) then plain Linear -------------------
    h = v
    for i in range(n_fc1):
        h = dot_bf16(h, next_w()) + b_ref[1 + i:2 + i, :]
        if i < n_fc1 - 1:
            h = jnp.maximum(h, 0.0)
    v1 = _softmax_masked(h, fc1_out)

    # --- fc2 head on concat([v, v1], 1) via the split first weight ----------
    bi = 1 + n_fc1
    part = dot_bf16(v, next_w())                 # rows acting on v
    h2 = part + dot_bf16(v1, next_w()) + b_ref[bi:bi + 1, :]   # rows on v1
    h2 = jnp.maximum(h2, 0.0)
    for i in range(1, n_fc2):
        h2 = dot_bf16(h2, next_w()) + b_ref[bi + i:bi + i + 1, :]
        if i < n_fc2 - 1:
            h2 = jnp.maximum(h2, 0.0)
    v2 = _softmax_masked(h2, fc2_out)

    v1_ref[...] = v1                             # lane-dense (B, 128) stores
    v2_ref[...] = v2


def make_forward(*, batch, enc_in, n_fc1, n_fc2, fc1_out, fc2_out):
    assert 0 < fc1_out <= PAD and 0 < fc2_out <= PAD and 0 < enc_in <= PAD
    n_w = 1 + n_fc1 + 1 + n_fc2                  # +1: split first fc2 weight
    n_b = 1 + n_fc1 + n_fc2
    kern = functools.partial(deep_insertion_kernel, n_fc1=n_fc1, n_fc2=n_fc2,
                             enc_in=enc_in, fc1_out=fc1_out, fc2_out=fc2_out)
    cost = pl.CostEstimate(
        flops=2 * batch * PAD * PAD * n_w,
        transcendentals=2 * batch * PAD,
        bytes_accessed=(4 * batch * enc_in + 2 * n_w * PAD * PAD
                        + 4 * n_b * PAD + 2 * 4 * batch * PAD),
    )

    @jax.jit
    def forward(weights_bf16, biases, x):
        v1p, v2p = pl.pallas_call(
            kern,
            out_shape=(jax.ShapeDtypeStruct((batch, PAD), jnp.float32),
                       jax.ShapeDtypeStruct((batch, PAD), jnp.float32)),
            in_specs=[
                pl.BlockSpec((batch, enc_in), lambda: (0, 0)),   # x (full block)
                pl.BlockSpec(memory_space=pl.ANY),               # weights in HBM
                pl.BlockSpec((n_b, PAD), lambda: (0, 0)),        # biases
            ],
            out_specs=(
                pl.BlockSpec((batch, PAD), lambda: (0, 0)),
                pl.BlockSpec((batch, PAD), lambda: (0, 0)),
            ),
            scratch_shapes=[
                pltpu.VMEM((2, PAD, PAD), jnp.bfloat16),         # slab double buffer
                pltpu.SemaphoreType.DMA((2,)),
            ],
            cost_estimate=cost,
        )(x, weights_bf16, biases)
        return v1p[:, :fc1_out], v2p[:, :fc2_out]

    return forward


# ----------------------------------------------------------------------------
# Deterministic synthetic parameters (PyTorch-like init), BN fold, lane padding
# ----------------------------------------------------------------------------
def init_linear(key, fan_in, fan_out):
    k1, k2 = jax.random.split(key)
    bound = 1.0 / float(fan_in) ** 0.5
    w = jax.random.uniform(k1, (fan_in, fan_out), jnp.float32, -bound, bound)
    b = jax.random.uniform(k2, (fan_out,), jnp.float32, -bound, bound)
    return w, b


def init_bn(key, n):
    """Eval-mode BN as per-feature affine (running_mean=0, running_var=1)."""
    k1, k2 = jax.random.split(key)
    gamma = jax.random.uniform(k1, (n,), jnp.float32, 0.5, 1.5)
    beta = jax.random.uniform(k2, (n,), jnp.float32, -0.1, 0.1)
    scale = gamma / jnp.sqrt(1.0 + BN_EPS)
    shift = beta
    return scale, shift


def build_raw_params(key, encoder_shape, fc1_shapes, fc2_shapes):
    """Layers as (W, b, bn_scale|None, bn_shift|None, relu: bool)."""
    k_enc, k_fc1, k_fc2 = jax.random.split(key, 3)

    def head(k, in_dim, shapes):
        layers = []
        dims = [in_dim] + list(shapes)
        for i in range(len(shapes)):
            kk = jax.random.fold_in(k, i)
            w, b = init_linear(jax.random.fold_in(kk, 0), dims[i], dims[i + 1])
            is_last = i == len(shapes) - 1
            if is_last:
                s = t = None
            else:
                s, t = init_bn(jax.random.fold_in(kk, 1), dims[i + 1])
            layers.append((w, b, s, t, not is_last))
        return layers

    w, b = init_linear(jax.random.fold_in(k_enc, 0), encoder_shape, encoder_shape)
    s, t = init_bn(jax.random.fold_in(k_enc, 1), encoder_shape)
    enc = (w, b, s, t, True)
    fc1 = head(k_fc1, encoder_shape, fc1_shapes)
    fc2 = head(k_fc2, encoder_shape + fc1_shapes[-1], fc2_shapes)
    return enc, fc1, fc2


def _fold(layer):
    w, b, s, t, _ = layer
    if s is None:
        return w, b
    return w * s[None, :], b * s + t             # fold BN affine into the Linear


def _pad_w(w):
    fi, fo = w.shape
    return jnp.pad(w, ((0, PAD - fi), (0, PAD - fo)))


def _pad_b(b):
    return jnp.pad(b, (0, PAD - b.shape[0]))


def fold_and_pack(raw, encoder_shape):
    """BN-fold, zero-pad to 128 lanes, stack.  Weights in bf16, biases f32 2D."""
    enc, fc1, fc2 = raw
    Ws, Bs = [], []
    w, b = _fold(enc)
    Ws.append(_pad_w(w)); Bs.append(_pad_b(b))
    for layer in fc1:
        w, b = _fold(layer)
        Ws.append(_pad_w(w)); Bs.append(_pad_b(b))
    for i, layer in enumerate(fc2):
        w, b = _fold(layer)
        if i == 0:
            Ws.append(_pad_w(w[:encoder_shape]))   # rows acting on v
            Ws.append(_pad_w(w[encoder_shape:]))   # rows acting on v1
        else:
            Ws.append(_pad_w(w))
        Bs.append(_pad_b(b))
    weights = jnp.stack(Ws).astype(jnp.bfloat16)   # (12, 128, 128) bf16
    biases = jnp.stack(Bs).astype(jnp.float32)     # (11, 128) f32
    return weights, biases


# ----------------------------------------------------------------------------
# References
# ----------------------------------------------------------------------------
def reference_forward(raw, x):
    """Pure-JAX f32 reference mirroring the PyTorch forward exactly."""
    def layer(h, p):
        w, b, s, t, relu = p
        y = h @ w + b
        if s is not None:
            y = y * s + t
        return jnp.maximum(y, 0.0) if relu else y

    enc, fc1, fc2 = raw
    v = layer(x, enc)
    h = v
    for p in fc1:
        h = layer(h, p)
    v1 = jax.nn.softmax(h, axis=1)
    h2 = jnp.concatenate([v, v1], axis=1)
    for p in fc2:
        h2 = layer(h2, p)
    v2 = jax.nn.softmax(h2, axis=1)
    return v1, v2


def _ref_masked_softmax(logits, n_valid):
    lane = jnp.arange(logits.shape[-1])[None, :]
    return jax.nn.softmax(jnp.where(lane < n_valid, logits, -jnp.inf), axis=-1)


def reference_forward_packed(weights, biases, x, *, enc_in, n_fc1, n_fc2,
                             fc1_out, fc2_out):
    """Mirrors the kernel math (folded BN, padding, bf16 dots) in pure JAX."""
    def dot(h, w):
        return jnp.dot(h.astype(jnp.bfloat16), w,
                       preferred_element_type=jnp.float32)

    v = jnp.maximum(dot(x, weights[0, :enc_in, :]) + biases[0][None, :], 0.0)
    h = v
    for i in range(n_fc1):
        h = dot(h, weights[1 + i]) + biases[1 + i][None, :]
        if i < n_fc1 - 1:
            h = jnp.maximum(h, 0.0)
    v1 = _ref_masked_softmax(h, fc1_out)
    bi = 1 + n_fc1
    h2 = dot(v, weights[bi]) + dot(v1, weights[bi + 1]) + biases[bi][None, :]
    h2 = jnp.maximum(h2, 0.0)
    for i in range(1, n_fc2):
        h2 = dot(h2, weights[bi + 1 + i]) + biases[bi + i][None, :]
        if i < n_fc2 - 1:
            h2 = jnp.maximum(h2, 0.0)
    v2 = _ref_masked_softmax(h2, fc2_out)
    return v1[:, :fc1_out], v2[:, :fc2_out]


if __name__ == "__main__":
    encoder_shape = 32
    fc1_shapes = [64, 64, 32, 32, 16]
    fc2_shapes = [64, 64, 32, 32, 16]
    batch = 8  # raise toward 128/256 rows per call in production for MXU util

    key = jax.random.PRNGKey(0)
    k_params, k_x = jax.random.split(key)
    raw = build_raw_params(k_params, encoder_shape, fc1_shapes, fc2_shapes)
    weights, biases = fold_and_pack(raw, encoder_shape)
    x = jax.random.normal(k_x, (batch, encoder_shape), dtype=jnp.float32)

    forward = make_forward(batch=batch, enc_in=encoder_shape,
                           n_fc1=len(fc1_shapes), n_fc2=len(fc2_shapes),
                           fc1_out=fc1_shapes[-1], fc2_out=fc2_shapes[-1])
    v1, v2 = forward(weights, biases, x)
    jax.block_until_ready((v1, v2))

    assert v1.shape == (batch, fc1_shapes[-1])
    assert v2.shape == (batch, fc2_shapes[-1])
    # softmax rows must sum to ~1 (approx-reciprocal tolerance)
    assert jnp.allclose(jnp.sum(v1, axis=-1), 1.0, atol=2e-2)
    assert jnp.allclose(jnp.sum(v2, axis=-1), 1.0, atol=2e-2)

    # tight check vs a pure-JAX reference that mirrors the kernel's bf16 math
    p1, p2 = reference_forward_packed(
        weights, biases, x, enc_in=encoder_shape,
        n_fc1=len(fc1_shapes), n_fc2=len(fc2_shapes),
        fc1_out=fc1_shapes[-1], fc2_out=fc2_shapes[-1])
    assert jnp.allclose(v1, p1, atol=2e-2), float(jnp.max(jnp.abs(v1 - p1)))
    assert jnp.allclose(v2, p2, atol=2e-2), float(jnp.max(jnp.abs(v2 - p2)))

    # looser check vs the unfused f32 PyTorch-semantics reference
    r1, r2 = reference_forward(raw, x)
    assert jnp.allclose(v1, r1, atol=5e-2), float(jnp.max(jnp.abs(v1 - r1)))
    assert jnp.allclose(v2, r2, atol=5e-2), float(jnp.max(jnp.abs(v2 - r2)))

    print("KERNEL_OK")
</pallas_src>

<mosaic_0001>
module attributes {stable_mosaic.version = 11 : i64} {
  func.func @deep_insertion_kernel(%arg0: memref<8x32xf32, #tpu.memory_space<vmem>>, %arg1: memref<12x128x128xbf16, #tpu.memory_space<any>>, %arg2: memref<11x128xf32, #tpu.memory_space<vmem>>, %arg3: memref<8x128xf32, #tpu.memory_space<vmem>>, %arg4: memref<8x128xf32, #tpu.memory_space<vmem>>, %arg5: memref<2x128x128xbf16, #tpu.memory_space<vmem>>, %arg6: memref<2x!tpu.dma_semaphore, #tpu.memory_space<semaphore_mem>>) attributes {dimension_semantics = [], scalar_prefetch = 0 : i64, scratch_operands = 2 : i64, tpu.core_type = #tpu.core_type<tc>} {
    %c0_i32 = arith.constant 0 : i32
    %c0_i32_0 = arith.constant 0 : i32
    %c0_i32_1 = arith.constant 0 : i32
    %c0_i32_2 = arith.constant 0 : i32
    %c0_i32_3 = arith.constant 0 : i32
    %0 = tpu.memref_slice %arg1[%c0_i32, %c0_i32_2, %c0_i32_3] : memref<12x128x128xbf16, #tpu.memory_space<any>> -> memref<1x128x128xbf16, #tpu.memory_space<any>>
    %1 = tpu.memref_squeeze %0 : memref<1x128x128xbf16, #tpu.memory_space<any>> -> memref<128x128xbf16, #tpu.memory_space<any>>
    %c0_i32_4 = arith.constant 0 : i32
    %c0_i32_5 = arith.constant 0 : i32
    %2 = tpu.memref_slice %arg5[%c0_i32_0, %c0_i32_4, %c0_i32_5] : memref<2x128x128xbf16, #tpu.memory_space<vmem>> -> memref<1x128x128xbf16, #tpu.memory_space<vmem>>
    %3 = tpu.memref_squeeze %2 : memref<1x128x128xbf16, #tpu.memory_space<vmem>> -> memref<128x128xbf16, #tpu.memory_space<vmem>>
    %4 = tpu.memref_slice %arg6[%c0_i32_1] : memref<2x!tpu.dma_semaphore, #tpu.memory_space<semaphore_mem>> -> memref<1x!tpu.dma_semaphore, #tpu.memory_space<semaphore_mem>>
    %5 = tpu.memref_squeeze %4 : memref<1x!tpu.dma_semaphore, #tpu.memory_space<semaphore_mem>> -> memref<!tpu.dma_semaphore, #tpu.memory_space<semaphore_mem>>
    tpu.enqueue_dma source(%1 : memref<128x128xbf16, #tpu.memory_space<any>>) target(%3 : memref<128x128xbf16, #tpu.memory_space<vmem>>) target_semaphore(%5 : memref<!tpu.dma_semaphore, #tpu.memory_space<semaphore_mem>>)
    %c0_i32_6 = arith.constant 0 : i32
    %c0_i32_7 = arith.constant 0 : i32
    %c0_i32_8 = arith.constant 0 : i32
    %c0_i32_9 = arith.constant 0 : i32
    %c0_i32_10 = arith.constant 0 : i32
    %6 = tpu.memref_slice %arg1[%c0_i32_6, %c0_i32_9, %c0_i32_10] : memref<12x128x128xbf16, #tpu.memory_space<any>> -> memref<1x128x128xbf16, #tpu.memory_space<any>>
    %7 = tpu.memref_squeeze %6 : memref<1x128x128xbf16, #tpu.memory_space<any>> -> memref<128x128xbf16, #tpu.memory_space<any>>
    %c0_i32_11 = arith.constant 0 : i32
    %c0_i32_12 = arith.constant 0 : i32
    %8 = tpu.memref_slice %arg5[%c0_i32_7, %c0_i32_11, %c0_i32_12] : memref<2x128x128xbf16, #tpu.memory_space<vmem>> -> memref<1x128x128xbf16, #tpu.memory_space<vmem>>
    %9 = tpu.memref_squeeze %8 : memref<1x128x128xbf16, #tpu.memory_space<vmem>> -> memref<128x128xbf16, #tpu.memory_space<vmem>>
    %10 = tpu.memref_slice %arg6[%c0_i32_8] : memref<2x!tpu.dma_semaphore, #tpu.memory_space<semaphore_mem>> -> memref<1x!tpu.dma_semaphore, #tpu.memory_space<semaphore_mem>>
    %11 = tpu.memref_squeeze %10 : memref<1x!tpu.dma_semaphore, #tpu.memory_space<semaphore_mem>> -> memref<!tpu.dma_semaphore, #tpu.memory_space<semaphore_mem>>
    tpu.wait_dma2 semaphore(%11 : memref<!tpu.dma_semaphore, #tpu.memory_space<semaphore_mem>>) src(%7 : memref<128x128xbf16, #tpu.memory_space<any>>) dst(%9 : memref<128x128xbf16, #tpu.memory_space<vmem>>)
    %c1_i32 = arith.constant 1 : i32
    %c1_i32_13 = arith.constant 1 : i32
    %c1_i32_14 = arith.constant 1 : i32
    %c0_i32_15 = arith.constant 0 : i32
    %c0_i32_16 = arith.constant 0 : i32
    %12 = tpu.memref_slice %arg1[%c1_i32, %c0_i32_15, %c0_i32_16] : memref<12x128x128xbf16, #tpu.memory_space<any>> -> memref<1x128x128xbf16, #tpu.memory_space<any>>
    %13 = tpu.memref_squeeze %12 : memref<1x128x128xbf16, #tpu.memory_space<any>> -> memref<128x128xbf16, #tpu.memory_space<any>>
    %c0_i32_17 = arith.constant 0 : i32
    %c0_i32_18 = arith.constant 0 : i32
    %14 = tpu.memref_slice %arg5[%c1_i32_13, %c0_i32_17, %c0_i32_18] : memref<2x128x128xbf16, #tpu.memory_space<vmem>> -> memref<1x128x128xbf16, #tpu.memory_space<vmem>>
    %15 = tpu.memref_squeeze %14 : memref<1x128x128xbf16, #tpu.memory_space<vmem>> -> memref<128x128xbf16, #tpu.memory_space<vmem>>
    %16 = tpu.memref_slice %arg6[%c1_i32_14] : memref<2x!tpu.dma_semaphore, #tpu.memory_space<semaphore_mem>> -> memref<1x!tpu.dma_semaphore, #tpu.memory_space<semaphore_mem>>
    %17 = tpu.memref_squeeze %16 : memref<1x!tpu.dma_semaphore, #tpu.memory_space<semaphore_mem>> -> memref<!tpu.dma_semaphore, #tpu.memory_space<semaphore_mem>>
    tpu.enqueue_dma source(%13 : memref<128x128xbf16, #tpu.memory_space<any>>) target(%15 : memref<128x128xbf16, #tpu.memory_space<vmem>>) target_semaphore(%17 : memref<!tpu.dma_semaphore, #tpu.memory_space<semaphore_mem>>)
    %c0 = arith.constant 0 : index
    %c0_19 = arith.constant 0 : index
    %c0_20 = arith.constant 0 : index
    %18 = vector.load %arg5[%c0, %c0_19, %c0_20] : memref<2x128x128xbf16, #tpu.memory_space<vmem>>, vector<1x128x128xbf16>
    %19 = vector.shape_cast %18 : vector<1x128x128xbf16> to vector<128x128xbf16>
    %c0_21 = arith.constant 0 : index
    %c0_22 = arith.constant 0 : index
    %20 = vector.load %arg0[%c0_21, %c0_22] : memref<8x32xf32, #tpu.memory_space<vmem>>, vector<8x32xf32>
    %21 = vector.extract_strided_slice %19 {offsets = [0, 0], sizes = [32, 128], strides = [1, 1]} : vector<128x128xbf16> to vector<32x128xbf16>
    %22 = arith.truncf %20 : vector<8x32xf32> to vector<8x32xbf16>
    %cst = arith.constant dense<0.000000e+00> : vector<8x128xf32>
    %23 = tpu.matmul %22, %21, %cst {dimension_numbers = #tpu.dot_dimension_numbers<[1], [0], [0], [1], [0, 0, 1, 1], [], []>} : vector<8x32xbf16>, vector<32x128xbf16>, vector<8x128xf32> -> vector<8x128xf32>
    %c0_23 = arith.constant 0 : index
    %c0_24 = arith.constant 0 : index
    %24 = vector.load %arg2[%c0_23, %c0_24] : memref<11x128xf32, #tpu.memory_space<vmem>>, vector<1x128xf32>
    %25 = vector.broadcast %24 : vector<1x128xf32> to vector<8x128xf32>
    %26 = arith.addf %23, %25 : vector<8x128xf32>
    %cst_25 = arith.constant 0.000000e+00 : f32
    %27 = vector.broadcast %cst_25 : f32 to vector<8x128xf32>
    %28 = arith.maximumf %26, %27 : vector<8x128xf32>
    %c1_i32_26 = arith.constant 1 : i32
    %c1_i32_27 = arith.constant 1 : i32
    %c1_i32_28 = arith.constant 1 : i32
    %c0_i32_29 = arith.constant 0 : i32
    %c0_i32_30 = arith.constant 0 : i32
    %29 = tpu.memref_slice %arg1[%c1_i32_26, %c0_i32_29, %c0_i32_30] : memref<12x128x128xbf16, #tpu.memory_space<any>> -> memref<1x128x128xbf16, #tpu.memory_space<any>>
    %30 = tpu.memref_squeeze %29 : memref<1x128x128xbf16, #tpu.memory_space<any>> -> memref<128x128xbf16, #tpu.memory_space<any>>
    %c0_i32_31 = arith.constant 0 : i32
    %c0_i32_32 = arith.constant 0 : i32
    %31 = tpu.memref_slice %arg5[%c1_i32_27, %c0_i32_31, %c0_i32_32] : memref<2x128x128xbf16, #tpu.memory_space<vmem>> -> memref<1x128x128xbf16, #tpu.memory_space<vmem>>
    %32 = tpu.memref_squeeze %31 : memref<1x128x128xbf16, #tpu.memory_space<vmem>> -> memref<128x128xbf16, #tpu.memory_space<vmem>>
    %33 = tpu.memref_slice %arg6[%c1_i32_28] : memref<2x!tpu.dma_semaphore, #tpu.memory_space<semaphore_mem>> -> memref<1x!tpu.dma_semaphore, #tpu.memory_space<semaphore_mem>>
    %34 = tpu.memref_squeeze %33 : memref<1x!tpu.dma_semaphore, #tpu.memory_space<semaphore_mem>> -> memref<!tpu.dma_semaphore, #tpu.memory_space<semaphore_mem>>
    tpu.wait_dma2 semaphore(%34 : memref<!tpu.dma_semaphore, #tpu.memory_space<semaphore_mem>>) src(%30 : memref<128x128xbf16, #tpu.memory_space<any>>) dst(%32 : memref<128x128xbf16, #tpu.memory_space<vmem>>)
    %c2_i32 = arith.constant 2 : i32
    %c0_i32_33 = arith.constant 0 : i32
    %c0_i32_34 = arith.constant 0 : i32
    %c0_i32_35 = arith.constant 0 : i32
    %c0_i32_36 = arith.constant 0 : i32
    %35 = tpu.memref_slice %arg1[%c2_i32, %c0_i32_35, %c0_i32_36] : memref<12x128x128xbf16, #tpu.memory_space<any>> -> memref<1x128x128xbf16, #tpu.memory_space<any>>
    %36 = tpu.memref_squeeze %35 : memref<1x128x128xbf16, #tpu.memory_space<any>> -> memref<128x128xbf16, #tpu.memory_space<any>>
    %c0_i32_37 = arith.constant 0 : i32
    %c0_i32_38 = arith.constant 0 : i32
    %37 = tpu.memref_slice %arg5[%c0_i32_33, %c0_i32_37, %c0_i32_38] : memref<2x128x128xbf16, #tpu.memory_space<vmem>> -> memref<1x128x128xbf16, #tpu.memory_space<vmem>>
    %38 = tpu.memref_squeeze %37 : memref<1x128x128xbf16, #tpu.memory_space<vmem>> -> memref<128x128xbf16, #tpu.memory_space<vmem>>
    %39 = tpu.memref_slice %arg6[%c0_i32_34] : memref<2x!tpu.dma_semaphore, #tpu.memory_space<semaphore_mem>> -> memref<1x!tpu.dma_semaphore, #tpu.memory_space<semaphore_mem>>
    %40 = tpu.memref_squeeze %39 : memref<1x!tpu.dma_semaphore, #tpu.memory_space<semaphore_mem>> -> memref<!tpu.dma_semaphore, #tpu.memory_space<semaphore_mem>>
    tpu.enqueue_dma source(%36 : memref<128x128xbf16, #tpu.memory_space<any>>) target(%38 : memref<128x128xbf16, #tpu.memory_space<vmem>>) target_semaphore(%40 : memref<!tpu.dma_semaphore, #tpu.memory_space<semaphore_mem>>)
    %c1 = arith.constant 1 : index
    %c0_39 = arith.constant 0 : index
    %c0_40 = arith.constant 0 : index
    %41 = vector.load %arg5[%c1, %c0_39, %c0_40] : memref<2x128x128xbf16, #tpu.memory_space<vmem>>, vector<1x128x128xbf16>
    %42 = vector.shape_cast %41 : vector<1x128x128xbf16> to vector<128x128xbf16>
    %43 = arith.truncf %28 : vector<8x128xf32> to vector<8x128xbf16>
    %cst_41 = arith.constant dense<0.000000e+00> : vector<8x128xf32>
    %44 = tpu.matmul %43, %42, %cst_41 {dimension_numbers = #tpu.dot_dimension_numbers<[1], [0], [0], [1], [0, 0, 1, 1], [], []>} : vector<8x128xbf16>, vector<128x128xbf16>, vector<8x128xf32> -> vector<8x128xf32>
    %c1_42 = arith.constant 1 : index
    %c0_43 = arith.constant 0 : index
    %45 = vector.load %arg2[%c1_42, %c0_43] : memref<11x128xf32, #tpu.memory_space<vmem>>, vector<1x128xf32>
    %46 = vector.broadcast %45 : vector<1x128xf32> to vector<8x128xf32>
    %47 = arith.addf %44, %46 : vector<8x128xf32>
    %cst_44 = arith.constant 0.000000e+00 : f32
    %48 = vector.broadcast %cst_44 : f32 to vector<8x128xf32>
    %49 = arith.maximumf %47, %48 : vector<8x128xf32>
    %c2_i32_45 = arith.constant 2 : i32
    %c0_i32_46 = arith.constant 0 : i32
    %c0_i32_47 = arith.constant 0 : i32
    %c0_i32_48 = arith.constant 0 : i32
    %c0_i32_49 = arith.constant 0 : i32
    %50 = tpu.memref_slice %arg1[%c2_i32_45, %c0_i32_48, %c0_i32_49] : memref<12x128x128xbf16, #tpu.memory_space<any>> -> memref<1x128x128xbf16, #tpu.memory_space<any>>
    %51 = tpu.memref_squeeze %50 : memref<1x128x128xbf16, #tpu.memory_space<any>> -> memref<128x128xbf16, #tpu.memory_space<any>>
    %c0_i32_50 = arith.constant 0 : i32
    %c0_i32_51 = arith.constant 0 : i32
    %52 = tpu.memref_slice %arg5[%c0_i32_46, %c0_i32_50, %c0_i32_51] : memref<2x128x128xbf16, #tpu.memory_space<vmem>> -> memref<1x128x128xbf16, #tpu.memory_space<vmem>>
    %53 = tpu.memref_squeeze %52 : memref<1x128x128xbf16, #tpu.memory_space<vmem>> -> memref<128x128xbf16, #tpu.memory_space<vmem>>
    %54 = tpu.memref_slice %arg6[%c0_i32_47] : memref<2x!tpu.dma_semaphore, #tpu.memory_space<semaphore_mem>> -> memref<1x!tpu.dma_semaphore, #tpu.memory_space<semaphore_mem>>
    %55 = tpu.memref_squeeze %54 : memref<1x!tpu.dma_semaphore, #tpu.memory_space<semaphore_mem>> -> memref<!tpu.dma_semaphore, #tpu.memory_space<semaphore_mem>>
    tpu.wait_dma2 semaphore(%55 : memref<!tpu.dma_semaphore, #tpu.memory_space<semaphore_mem>>) src(%51 : memref<128x128xbf16, #tpu.memory_space<any>>) dst(%53 : memref<128x128xbf16, #tpu.memory_space<vmem>>)
    %c3_i32 = arith.constant 3 : i32
    %c1_i32_52 = arith.constant 1 : i32
    %c1_i32_53 = arith.constant 1 : i32
    %c0_i32_54 = arith.constant 0 : i32
    %c0_i32_55 = arith.constant 0 : i32
    %56 = tpu.memref_slice %arg1[%c3_i32, %c0_i32_54, %c0_i32_55] : memref<12x128x128xbf16, #tpu.memory_space<any>> -> memref<1x128x128xbf16, #tpu.memory_space<any>>
    %57 = tpu.memref_squeeze %56 : memref<1x128x128xbf16, #tpu.memory_space<any>> -> memref<128x128xbf16, #tpu.memory_space<any>>
    %c0_i32_56 = arith.constant 0 : i32
    %c0_i32_57 = arith.constant 0 : i32
    %58 = tpu.memref_slice %arg5[%c1_i32_52, %c0_i32_56, %c0_i32_57] : memref<2x128x128xbf16, #tpu.memory_space<vmem>> -> memref<1x128x128xbf16, #tpu.memory_space<vmem>>
    %59 = tpu.memref_squeeze %58 : memref<1x128x128xbf16, #tpu.memory_space<vmem>> -> memref<128x128xbf16, #tpu.memory_space<vmem>>
    %60 = tpu.memref_slice %arg6[%c1_i32_53] : memref<2x!tpu.dma_semaphore, #tpu.memory_space<semaphore_mem>> -> memref<1x!tpu.dma_semaphore, #tpu.memory_space<semaphore_mem>>
    %61 = tpu.memref_squeeze %60 : memref<1x!tpu.dma_semaphore, #tpu.memory_space<semaphore_mem>> -> memref<!tpu.dma_semaphore, #tpu.memory_space<semaphore_mem>>
    tpu.enqueue_dma source(%57 : memref<128x128xbf16, #tpu.memory_space<any>>) target(%59 : memref<128x128xbf16, #tpu.memory_space<vmem>>) target_semaphore(%61 : memref<!tpu.dma_semaphore, #tpu.memory_space<semaphore_mem>>)
    %c0_58 = arith.constant 0 : index
    %c0_59 = arith.constant 0 : index
    %c0_60 = arith.constant 0 : index
    %62 = vector.load %arg5[%c0_58, %c0_59, %c0_60] : memref<2x128x128xbf16, #tpu.memory_space<vmem>>, vector<1x128x128xbf16>
    %63 = vector.shape_cast %62 : vector<1x128x128xbf16> to vector<128x128xbf16>
    %64 = arith.truncf %49 : vector<8x128xf32> to vector<8x128xbf16>
    %cst_61 = arith.constant dense<0.000000e+00> : vector<8x128xf32>
    %65 = tpu.matmul %64, %63, %cst_61 {dimension_numbers = #tpu.dot_dimension_numbers<[1], [0], [0], [1], [0, 0, 1, 1], [], []>} : vector<8x128xbf16>, vector<128x128xbf16>, vector<8x128xf32> -> vector<8x128xf32>
    %c2 = arith.constant 2 : index
    %c0_62 = arith.constant 0 : index
    %66 = vector.load %arg2[%c2, %c0_62] : memref<11x128xf32, #tpu.memory_space<vmem>>, vector<1x128xf32>
    %67 = vector.broadcast %66 : vector<1x128xf32> to vector<8x128xf32>
    %68 = arith.addf %65, %67 : vector<8x128xf32>
    %cst_63 = arith.constant 0.000000e+00 : f32
    %69 = vector.broadcast %cst_63 : f32 to vector<8x128xf32>
    %70 = arith.maximumf %68, %69 : vector<8x128xf32>
    %c3_i32_64 = arith.constant 3 : i32
    %c1_i32_65 = arith.constant 1 : i32
    %c1_i32_66 = arith.constant 1 : i32
    %c0_i32_67 = arith.constant 0 : i32
    %c0_i32_68 = arith.constant 0 : i32
    %71 = tpu.memref_slice %arg1[%c3_i32_64, %c0_i32_67, %c0_i32_68] : memref<12x128x128xbf16, #tpu.memory_space<any>> -> memref<1x128x128xbf16, #tpu.memory_space<any>>
    %72 = tpu.memref_squeeze %71 : memref<1x128x128xbf16, #tpu.memory_space<any>> -> memref<128x128xbf16, #tpu.memory_space<any>>
    %c0_i32_69 = arith.constant 0 : i32
    %c0_i32_70 = arith.constant 0 : i32
    %73 = tpu.memref_slice %arg5[%c1_i32_65, %c0_i32_69, %c0_i32_70] : memref<2x128x128xbf16, #tpu.memory_space<vmem>> -> memref<1x128x128xbf16, #tpu.memory_space<vmem>>
    %74 = tpu.memref_squeeze %73 : memref<1x128x128xbf16, #tpu.memory_space<vmem>> -> memref<128x128xbf16, #tpu.memory_space<vmem>>
    %75 = tpu.memref_slice %arg6[%c1_i32_66] : memref<2x!tpu.dma_semaphore, #tpu.memory_space<semaphore_mem>> -> memref<1x!tpu.dma_semaphore, #tpu.memory_space<semaphore_mem>>
    %76 = tpu.memref_squeeze %75 : memref<1x!tpu.dma_semaphore, #tpu.memory_space<semaphore_mem>> -> memref<!tpu.dma_semaphore, #tpu.memory_space<semaphore_mem>>
    tpu.wait_dma2 semaphore(%76 : memref<!tpu.dma_semaphore, #tpu.memory_space<semaphore_mem>>) src(%72 : memref<128x128xbf16, #tpu.memory_space<any>>) dst(%74 : memref<128x128xbf16, #tpu.memory_space<vmem>>)
    %c4_i32 = arith.constant 4 : i32
    %c0_i32_71 = arith.constant 0 : i32
    %c0_i32_72 = arith.constant 0 : i32
    %c0_i32_73 = arith.constant 0 : i32
    %c0_i32_74 = arith.constant 0 : i32
    %77 = tpu.memref_slice %arg1[%c4_i32, %c0_i32_73, %c0_i32_74] : memref<12x128x128xbf16, #tpu.memory_space<any>> -> memref<1x128x128xbf16, #tpu.memory_space<any>>
    %78 = tpu.memref_squeeze %77 : memref<1x128x128xbf16, #tpu.memory_space<any>> -> memref<128x128xbf16, #tpu.memory_space<any>>
    %c0_i32_75 = arith.constant 0 : i32
    %c0_i32_76 = arith.constant 0 : i32
    %79 = tpu.memref_slice %arg5[%c0_i32_71, %c0_i32_75, %c0_i32_76] : memref<2x128x128xbf16, #tpu.memory_space<vmem>> -> memref<1x128x128xbf16, #tpu.memory_space<vmem>>
    %80 = tpu.memref_squeeze %79 : memref<1x128x128xbf16, #tpu.memory_space<vmem>> -> memref<128x128xbf16, #tpu.memory_space<vmem>>
    %81 = tpu.memref_slice %arg6[%c0_i32_72] : memref<2x!tpu.dma_semaphore, #tpu.memory_space<semaphore_mem>> -> memref<1x!tpu.dma_semaphore, #tpu.memory_space<semaphore_mem>>
    %82 = tpu.memref_squeeze %81 : memref<1x!tpu.dma_semaphore, #tpu.memory_space<semaphore_mem>> -> memref<!tpu.dma_semaphore, #tpu.memory_space<semaphore_mem>>
    tpu.enqueue_dma source(%78 : memref<128x128xbf16, #tpu.memory_space<any>>) target(%80 : memref<128x128xbf16, #tpu.memory_space<vmem>>) target_semaphore(%82 : memref<!tpu.dma_semaphore, #tpu.memory_space<semaphore_mem>>)
    %c1_77 = arith.constant 1 : index
    %c0_78 = arith.constant 0 : index
    %c0_79 = arith.constant 0 : index
    %83 = vector.load %arg5[%c1_77, %c0_78, %c0_79] : memref<2x128x128xbf16, #tpu.memory_space<vmem>>, vector<1x128x128xbf16>
    %84 = vector.shape_cast %83 : vector<1x128x128xbf16> to vector<128x128xbf16>
    %85 = arith.truncf %70 : vector<8x128xf32> to vector<8x128xbf16>
    %cst_80 = arith.constant dense<0.000000e+00> : vector<8x128xf32>
    %86 = tpu.matmul %85, %84, %cst_80 {dimension_numbers = #tpu.dot_dimension_numbers<[1], [0], [0], [1], [0, 0, 1, 1], [], []>} : vector<8x128xbf16>, vector<128x128xbf16>, vector<8x128xf32> -> vector<8x128xf32>
    %c3 = arith.constant 3 : index
    %c0_81 = arith.constant 0 : index
    %87 = vector.load %arg2[%c3, %c0_81] : memref<11x128xf32, #tpu.memory_space<vmem>>, vector<1x128xf32>
    %88 = vector.broadcast %87 : vector<1x128xf32> to vector<8x128xf32>
    %89 = arith.addf %86, %88 : vector<8x128xf32>
    %cst_82 = arith.constant 0.000000e+00 : f32
    %90 = vector.broadcast %cst_82 : f32 to vector<8x128xf32>
    %91 = arith.maximumf %89, %90 : vector<8x128xf32>
    %c4_i32_83 = arith.constant 4 : i32
    %c0_i32_84 = arith.constant 0 : i32
    %c0_i32_85 = arith.constant 0 : i32
    %c0_i32_86 = arith.constant 0 : i32
    %c0_i32_87 = arith.constant 0 : i32
    %92 = tpu.memref_slice %arg1[%c4_i32_83, %c0_i32_86, %c0_i32_87] : memref<12x128x128xbf16, #tpu.memory_space<any>> -> memref<1x128x128xbf16, #tpu.memory_space<any>>
    %93 = tpu.memref_squeeze %92 : memref<1x128x128xbf16, #tpu.memory_space<any>> -> memref<128x128xbf16, #tpu.memory_space<any>>
    %c0_i32_88 = arith.constant 0 : i32
    %c0_i32_89 = arith.constant 0 : i32
    %94 = tpu.memref_slice %arg5[%c0_i32_84, %c0_i32_88, %c0_i32_89] : memref<2x128x128xbf16, #tpu.memory_space<vmem>> -> memref<1x128x128xbf16, #tpu.memory_space<vmem>>
    %95 = tpu.memref_squeeze %94 : memref<1x128x128xbf16, #tpu.memory_space<vmem>> -> memref<128x128xbf16, #tpu.memory_space<vmem>>
    %96 = tpu.memref_slice %arg6[%c0_i32_85] : memref<2x!tpu.dma_semaphore, #tpu.memory_space<semaphore_mem>> -> memref<1x!tpu.dma_semaphore, #tpu.memory_space<semaphore_mem>>
    %97 = tpu.memref_squeeze %96 : memref<1x!tpu.dma_semaphore, #tpu.memory_space<semaphore_mem>> -> memref<!tpu.dma_semaphore, #tpu.memory_space<semaphore_mem>>
    tpu.wait_dma2 semaphore(%97 : memref<!tpu.dma_semaphore, #tpu.memory_space<semaphore_mem>>) src(%93 : memref<128x128xbf16, #tpu.memory_space<any>>) dst(%95 : memref<128x128xbf16, #tpu.memory_space<vmem>>)
    %c5_i32 = arith.constant 5 : i32
    %c1_i32_90 = arith.constant 1 : i32
    %c1_i32_91 = arith.constant 1 : i32
    %c0_i32_92 = arith.constant 0 : i32
    %c0_i32_93 = arith.constant 0 : i32
    %98 = tpu.memref_slice %arg1[%c5_i32, %c0_i32_92, %c0_i32_93] : memref<12x128x128xbf16, #tpu.memory_space<any>> -> memref<1x128x128xbf16, #tpu.memory_space<any>>
    %99 = tpu.memref_squeeze %98 : memref<1x128x128xbf16, #tpu.memory_space<any>> -> memref<128x128xbf16, #tpu.memory_space<any>>
    %c0_i32_94 = arith.constant 0 : i32
    %c0_i32_95 = arith.constant 0 : i32
    %100 = tpu.memref_slice %arg5[%c1_i32_90, %c0_i32_94, %c0_i32_95] : memref<2x128x128xbf16, #tpu.memory_space<vmem>> -> memref<1x128x128xbf16, #tpu.memory_space<vmem>>
    %101 = tpu.memref_squeeze %100 : memref<1x128x128xbf16, #tpu.memory_space<vmem>> -> memref<128x128xbf16, #tpu.memory_space<vmem>>
    %102 = tpu.memref_slice %arg6[%c1_i32_91] : memref<2x!tpu.dma_semaphore, #tpu.memory_space<semaphore_mem>> -> memref<1x!tpu.dma_semaphore, #tpu.memory_space<semaphore_mem>>
    %103 = tpu.memref_squeeze %102 : memref<1x!tpu.dma_semaphore, #tpu.memory_space<semaphore_mem>> -> memref<!tpu.dma_semaphore, #tpu.memory_space<semaphore_mem>>
    tpu.enqueue_dma source(%99 : memref<128x128xbf16, #tpu.memory_space<any>>) target(%101 : memref<128x128xbf16, #tpu.memory_space<vmem>>) target_semaphore(%103 : memref<!tpu.dma_semaphore, #tpu.memory_space<semaphore_mem>>)
    %c0_96 = arith.constant 0 : index
    %c0_97 = arith.constant 0 : index
    %c0_98 = arith.constant 0 : index
    %104 = vector.load %arg5[%c0_96, %c0_97, %c0_98] : memref<2x128x128xbf16, #tpu.memory_space<vmem>>, vector<1x128x128xbf16>
    %105 = vector.shape_cast %104 : vector<1x128x128xbf16> to vector<128x128xbf16>
    %106 = arith.truncf %91 : vector<8x128xf32> to vector<8x128xbf16>
    %cst_99 = arith.constant dense<0.000000e+00> : vector<8x128xf32>
    %107 = tpu.matmul %106, %105, %cst_99 {dimension_numbers = #tpu.dot_dimension_numbers<[1], [0], [0], [1], [0, 0, 1, 1], [], []>} : vector<8x128xbf16>, vector<128x128xbf16>, vector<8x128xf32> -> vector<8x128xf32>
    %c4 = arith.constant 4 : index
    %c0_100 = arith.constant 0 : index
    %108 = vector.load %arg2[%c4, %c0_100] : memref<11x128xf32, #tpu.memory_space<vmem>>, vector<1x128xf32>
    %109 = vector.broadcast %108 : vector<1x128xf32> to vector<8x128xf32>
    %110 = arith.addf %107, %109 : vector<8x128xf32>
    %cst_101 = arith.constant 0.000000e+00 : f32
    %111 = vector.broadcast %cst_101 : f32 to vector<8x128xf32>
    %112 = arith.maximumf %110, %111 : vector<8x128xf32>
    %c5_i32_102 = arith.constant 5 : i32
    %c1_i32_103 = arith.constant 1 : i32
    %c1_i32_104 = arith.constant 1 : i32
    %c0_i32_105 = arith.constant 0 : i32
    %c0_i32_106 = arith.constant 0 : i32
    %113 = tpu.memref_slice %arg1[%c5_i32_102, %c0_i32_105, %c0_i32_106] : memref<12x128x128xbf16, #tpu.memory_space<any>> -> memref<1x128x128xbf16, #tpu.memory_space<any>>
    %114 = tpu.memref_squeeze %113 : memref<1x128x128xbf16, #tpu.memory_space<any>> -> memref<128x128xbf16, #tpu.memory_space<any>>
    %c0_i32_107 = arith.constant 0 : i32
    %c0_i32_108 = arith.constant 0 : i32
    %115 = tpu.memref_slice %arg5[%c1_i32_103, %c0_i32_107, %c0_i32_108] : memref<2x128x128xbf16, #tpu.memory_space<vmem>> -> memref<1x128x128xbf16, #tpu.memory_space<vmem>>
    %116 = tpu.memref_squeeze %115 : memref<1x128x128xbf16, #tpu.memory_space<vmem>> -> memref<128x128xbf16, #tpu.memory_space<vmem>>
    %117 = tpu.memref_slice %arg6[%c1_i32_104] : memref<2x!tpu.dma_semaphore, #tpu.memory_space<semaphore_mem>> -> memref<1x!tpu.dma_semaphore, #tpu.memory_space<semaphore_mem>>
    %118 = tpu.memref_squeeze %117 : memref<1x!tpu.dma_semaphore, #tpu.memory_space<semaphore_mem>> -> memref<!tpu.dma_semaphore, #tpu.memory_space<semaphore_mem>>
    tpu.wait_dma2 semaphore(%118 : memref<!tpu.dma_semaphore, #tpu.memory_space<semaphore_mem>>) src(%114 : memref<128x128xbf16, #tpu.memory_space<any>>) dst(%116 : memref<128x128xbf16, #tpu.memory_space<vmem>>)
    %c6_i32 = arith.constant 6 : i32
    %c0_i32_109 = arith.constant 0 : i32
    %c0_i32_110 = arith.constant 0 : i32
    %c0_i32_111 = arith.constant 0 : i32
    %c0_i32_112 = arith.constant 0 : i32
    %119 = tpu.memref_slice %arg1[%c6_i32, %c0_i32_111, %c0_i32_112] : memref<12x128x128xbf16, #tpu.memory_space<any>> -> memref<1x128x128xbf16, #tpu.memory_space<any>>
    %120 = tpu.memref_squeeze %119 : memref<1x128x128xbf16, #tpu.memory_space<any>> -> memref<128x128xbf16, #tpu.memory_space<any>>
    %c0_i32_113 = arith.constant 0 : i32
    %c0_i32_114 = arith.constant 0 : i32
    %121 = tpu.memref_slice %arg5[%c0_i32_109, %c0_i32_113, %c0_i32_114] : memref<2x128x128xbf16, #tpu.memory_space<vmem>> -> memref<1x128x128xbf16, #tpu.memory_space<vmem>>
    %122 = tpu.memref_squeeze %121 : memref<1x128x128xbf16, #tpu.memory_space<vmem>> -> memref<128x128xbf16, #tpu.memory_space<vmem>>
    %123 = tpu.memref_slice %arg6[%c0_i32_110] : memref<2x!tpu.dma_semaphore, #tpu.memory_space<semaphore_mem>> -> memref<1x!tpu.dma_semaphore, #tpu.memory_space<semaphore_mem>>
    %124 = tpu.memref_squeeze %123 : memref<1x!tpu.dma_semaphore, #tpu.memory_space<semaphore_mem>> -> memref<!tpu.dma_semaphore, #tpu.memory_space<semaphore_mem>>
    tpu.enqueue_dma source(%120 : memref<128x128xbf16, #tpu.memory_space<any>>) target(%122 : memref<128x128xbf16, #tpu.memory_space<vmem>>) target_semaphore(%124 : memref<!tpu.dma_semaphore, #tpu.memory_space<semaphore_mem>>)
    %c1_115 = arith.constant 1 : index
    %c0_116 = arith.constant 0 : index
    %c0_117 = arith.constant 0 : index
    %125 = vector.load %arg5[%c1_115, %c0_116, %c0_117] : memref<2x128x128xbf16, #tpu.memory_space<vmem>>, vector<1x128x128xbf16>
    %126 = vector.shape_cast %125 : vector<1x128x128xbf16> to vector<128x128xbf16>
    %127 = arith.truncf %112 : vector<8x128xf32> to vector<8x128xbf16>
    %cst_118 = arith.constant dense<0.000000e+00> : vector<8x128xf32>
    %128 = tpu.matmul %127, %126, %cst_118 {dimension_numbers = #tpu.dot_dimension_numbers<[1], [0], [0], [1], [0, 0, 1, 1], [], []>} : vector<8x128xbf16>, vector<128x128xbf16>, vector<8x128xf32> -> vector<8x128xf32>
    %c5 = arith.constant 5 : index
    %c0_119 = arith.constant 0 : index
    %129 = vector.load %arg2[%c5, %c0_119] : memref<11x128xf32, #tpu.memory_space<vmem>>, vector<1x128xf32>
    %130 = vector.broadcast %129 : vector<1x128xf32> to vector<8x128xf32>
    %131 = arith.addf %128, %130 : vector<8x128xf32>
    %132 = tpu.iota {dimensions = array<i32: 1>} : vector<8x128xi32>
    %c16_i32 = arith.constant 16 : i32
    %133 = vector.broadcast %c16_i32 : i32 to vector<8x128xi32>
    %134 = arith.cmpi slt, %132, %133 : vector<8x128xi32>
    %cst_120 = arith.constant 0xFF800000 : f32
    %135 = vector.broadcast %cst_120 : f32 to vector<8x128xf32>
    %136 = arith.select %134, %131, %135 : vector<8x128xi1>, vector<8x128xf32>
    %cst_121 = arith.constant dense<0xFF800000> : vector<8xf32>
    %137 = vector.multi_reduction <maximumf>, %136, %cst_121 [1] : vector<8x128xf32> to vector<8xf32>
    %138 = vector.shape_cast %137 : vector<8xf32> to vector<8x1xf32>
    %139 = vector.broadcast %138 : vector<8x1xf32> to vector<8x128xf32>
    %140 = arith.subf %136, %139 : vector<8x128xf32>
    %141 = math.exp %140 : vector<8x128xf32>
    %cst_122 = arith.constant dense<0.000000e+00> : vector<8xf32>
    %142 = vector.multi_reduction <add>, %141, %cst_122 [1] : vector<8x128xf32> to vector<8xf32>
    %143 = vector.shape_cast %142 : vector<8xf32> to vector<8x1xf32>
    %144 = tpu.reciprocal %143 {approx = true} : vector<8x1xf32> -> vector<8x1xf32>
    %145 = vector.broadcast %144 : vector<8x1xf32> to vector<8x128xf32>
    %146 = arith.mulf %141, %145 : vector<8x128xf32>
    %c6_i32_123 = arith.constant 6 : i32
    %c0_i32_124 = arith.constant 0 : i32
    %c0_i32_125 = arith.constant 0 : i32
    %c0_i32_126 = arith.constant 0 : i32
    %c0_i32_127 = arith.constant 0 : i32
    %147 = tpu.memref_slice %arg1[%c6_i32_123, %c0_i32_126, %c0_i32_127] : memref<12x128x128xbf16, #tpu.memory_space<any>> -> memref<1x128x128xbf16, #tpu.memory_space<any>>
    %148 = tpu.memref_squeeze %147 : memref<1x128x128xbf16, #tpu.memory_space<any>> -> memref<128x128xbf16, #tpu.memory_space<any>>
    %c0_i32_128 = arith.constant 0 : i32
    %c0_i32_129 = arith.constant 0 : i32
    %149 = tpu.memref_slice %arg5[%c0_i32_124, %c0_i32_128, %c0_i32_129] : memref<2x128x128xbf16, #tpu.memory_space<vmem>> -> memref<1x128x128xbf16, #tpu.memory_space<vmem>>
    %150 = tpu.memref_squeeze %149 : memref<1x128x128xbf16, #tpu.memory_space<vmem>> -> memref<128x128xbf16, #tpu.memory_space<vmem>>
    %151 = tpu.memref_slice %arg6[%c0_i32_125] : memref<2x!tpu.dma_semaphore, #tpu.memory_space<semaphore_mem>> -> memref<1x!tpu.dma_semaphore, #tpu.memory_space<semaphore_mem>>
    %152 = tpu.memref_squeeze %151 : memref<1x!tpu.dma_semaphore, #tpu.memory_space<semaphore_mem>> -> memref<!tpu.dma_semaphore, #tpu.memory_space<semaphore_mem>>
    tpu.wait_dma2 semaphore(%152 : memref<!tpu.dma_semaphore, #tpu.memory_space<semaphore_mem>>) src(%148 : memref<128x128xbf16, #tpu.memory_space<any>>) dst(%150 : memref<128x128xbf16, #tpu.memory_space<vmem>>)
    %c7_i32 = arith.constant 7 : i32
    %c1_i32_130 = arith.constant 1 : i32
    %c1_i32_131 = arith.constant 1 : i32
    %c0_i32_132 = arith.constant 0 : i32
    %c0_i32_133 = arith.constant 0 : i32
    %153 = tpu.memref_slice %arg1[%c7_i32, %c0_i32_132, %c0_i32_133] : memref<12x128x128xbf16, #tpu.memory_space<any>> -> memref<1x128x128xbf16, #tpu.memory_space<any>>
    %154 = tpu.memref_squeeze %153 : memref<1x128x128xbf16, #tpu.memory_space<any>> -> memref<128x128xbf16, #tpu.memory_space<any>>
    %c0_i32_134 = arith.constant 0 : i32
    %c0_i32_135 = arith.constant 0 : i32
    %155 = tpu.memref_slice %arg5[%c1_i32_130, %c0_i32_134, %c0_i32_135] : memref<2x128x128xbf16, #tpu.memory_space<vmem>> -> memref<1x128x128xbf16, #tpu.memory_space<vmem>>
    %156 = tpu.memref_squeeze %155 : memref<1x128x128xbf16, #tpu.memory_space<vmem>> -> memref<128x128xbf16, #tpu.memory_space<vmem>>
    %157 = tpu.memref_slice %arg6[%c1_i32_131] : memref<2x!tpu.dma_semaphore, #tpu.memory_space<semaphore_mem>> -> memref<1x!tpu.dma_semaphore, #tpu.memory_space<semaphore_mem>>
    %158 = tpu.memref_squeeze %157 : memref<1x!tpu.dma_semaphore, #tpu.memory_space<semaphore_mem>> -> memref<!tpu.dma_semaphore, #tpu.memory_space<semaphore_mem>>
    tpu.enqueue_dma source(%154 : memref<128x128xbf16, #tpu.memory_space<any>>) target(%156 : memref<128x128xbf16, #tpu.memory_space<vmem>>) target_semaphore(%158 : memref<!tpu.dma_semaphore, #tpu.memory_space<semaphore_mem>>)
    %c0_136 = arith.constant 0 : index
    %c0_137 = arith.constant 0 : index
    %c0_138 = arith.constant 0 : index
    %159 = vector.load %arg5[%c0_136, %c0_137, %c0_138] : memref<2x128x128xbf16, #tpu.memory_space<vmem>>, vector<1x128x128xbf16>
    %160 = vector.shape_cast %159 : vector<1x128x128xbf16> to vector<128x128xbf16>
    %161 = arith.truncf %28 : vector<8x128xf32> to vector<8x128xbf16>
    %cst_139 = arith.constant dense<0.000000e+00> : vector<8x128xf32>
    %162 = tpu.matmul %161, %160, %cst_139 {dimension_numbers = #tpu.dot_dimension_numbers<[1], [0], [0], [1], [0, 0, 1, 1], [], []>} : vector<8x128xbf16>, vector<128x128xbf16>, vector<8x128xf32> -> vector<8x128xf32>
    %c7_i32_140 = arith.constant 7 : i32
    %c1_i32_141 = arith.constant 1 : i32
    %c1_i32_142 = arith.constant 1 : i32
    %c0_i32_143 = arith.constant 0 : i32
    %c0_i32_144 = arith.constant 0 : i32
    %163 = tpu.memref_slice %arg1[%c7_i32_140, %c0_i32_143, %c0_i32_144] : memref<12x128x128xbf16, #tpu.memory_space<any>> -> memref<1x128x128xbf16, #tpu.memory_space<any>>
    %164 = tpu.memref_squeeze %163 : memref<1x128x128xbf16, #tpu.memory_space<any>> -> memref<128x128xbf16, #tpu.memory_space<any>>
    %c0_i32_145 = arith.constant 0 : i32
    %c0_i32_146 = arith.constant 0 : i32
    %165 = tpu.memref_slice %arg5[%c1_i32_141, %c0_i32_145, %c0_i32_146] : memref<2x128x128xbf16, #tpu.memory_space<vmem>> -> memref<1x128x128xbf16, #tpu.memory_space<vmem>>
    %166 = tpu.memref_squeeze %165 : memref<1x128x128xbf16, #tpu.memory_space<vmem>> -> memref<128x128xbf16, #tpu.memory_space<vmem>>
    %167 = tpu.memref_slice %arg6[%c1_i32_142] : memref<2x!tpu.dma_semaphore, #tpu.memory_space<semaphore_mem>> -> memref<1x!tpu.dma_semaphore, #tpu.memory_space<semaphore_mem>>
    %168 = tpu.memref_squeeze %167 : memref<1x!tpu.dma_semaphore, #tpu.memory_space<semaphore_mem>> -> memref<!tpu.dma_semaphore, #tpu.memory_space<semaphore_mem>>
    tpu.wait_dma2 semaphore(%168 : memref<!tpu.dma_semaphore, #tpu.memory_space<semaphore_mem>>) src(%164 : memref<128x128xbf16, #tpu.memory_space<any>>) dst(%166 : memref<128x128xbf16, #tpu.memory_space<vmem>>)
    %c8_i32 = arith.constant 8 : i32
    %c0_i32_147 = arith.constant 0 : i32
    %c0_i32_148 = arith.constant 0 : i32
    %c0_i32_149 = arith.constant 0 : i32
    %c0_i32_150 = arith.constant 0 : i32
    %169 = tpu.memref_slice %arg1[%c8_i32, %c0_i32_149, %c0_i32_150] : memref<12x128x128xbf16, #tpu.memory_space<any>> -> memref<1x128x128xbf16, #tpu.memory_space<any>>
    %170 = tpu.memref_squeeze %169 : memref<1x128x128xbf16, #tpu.memory_space<any>> -> memref<128x128xbf16, #tpu.memory_space<any>>
    %c0_i32_151 = arith.constant 0 : i32
    %c0_i32_152 = arith.constant 0 : i32
    %171 = tpu.memref_slice %arg5[%c0_i32_147, %c0_i32_151, %c0_i32_152] : memref<2x128x128xbf16, #tpu.memory_space<vmem>> -> memref<1x128x128xbf16, #tpu.memory_space<vmem>>
    %172 = tpu.memref_squeeze %171 : memref<1x128x128xbf16, #tpu.memory_space<vmem>> -> memref<128x128xbf16, #tpu.memory_space<vmem>>
    %173 = tpu.memref_slice %arg6[%c0_i32_148] : memref<2x!tpu.dma_semaphore, #tpu.memory_space<semaphore_mem>> -> memref<1x!tpu.dma_semaphore, #tpu.memory_space<semaphore_mem>>
    %174 = tpu.memref_squeeze %173 : memref<1x!tpu.dma_semaphore, #tpu.memory_space<semaphore_mem>> -> memref<!tpu.dma_semaphore, #tpu.memory_space<semaphore_mem>>
    tpu.enqueue_dma source(%170 : memref<128x128xbf16, #tpu.memory_space<any>>) target(%172 : memref<128x128xbf16, #tpu.memory_space<vmem>>) target_semaphore(%174 : memref<!tpu.dma_semaphore, #tpu.memory_space<semaphore_mem>>)
    %c1_153 = arith.constant 1 : index
    %c0_154 = arith.constant 0 : index
    %c0_155 = arith.constant 0 : index
    %175 = vector.load %arg5[%c1_153, %c0_154, %c0_155] : memref<2x128x128xbf16, #tpu.memory_space<vmem>>, vector<1x128x128xbf16>
    %176 = vector.shape_cast %175 : vector<1x128x128xbf16> to vector<128x128xbf16>
    %177 = arith.truncf %146 : vector<8x128xf32> to vector<8x128xbf16>
    %cst_156 = arith.constant dense<0.000000e+00> : vector<8x128xf32>
    %178 = tpu.matmul %177, %176, %cst_156 {dimension_numbers = #tpu.dot_dimension_numbers<[1], [0], [0], [1], [0, 0, 1, 1], [], []>} : vector<8x128xbf16>, vector<128x128xbf16>, vector<8x128xf32> -> vector<8x128xf32>
    %179 = arith.addf %162, %178 : vector<8x128xf32>
    %c6 = arith.constant 6 : index
    %c0_157 = arith.constant 0 : index
    %180 = vector.load %arg2[%c6, %c0_157] : memref<11x128xf32, #tpu.memory_space<vmem>>, vector<1x128xf32>
    %181 = vector.broadcast %180 : vector<1x128xf32> to vector<8x128xf32>
    %182 = arith.addf %179, %181 : vector<8x128xf32>
    %cst_158 = arith.constant 0.000000e+00 : f32
    %183 = vector.broadcast %cst_158 : f32 to vector<8x128xf32>
    %184 = arith.maximumf %182, %183 : vector<8x128xf32>
    %c8_i32_159 = arith.constant 8 : i32
    %c0_i32_160 = arith.constant 0 : i32
    %c0_i32_161 = arith.constant 0 : i32
    %c0_i32_162 = arith.constant 0 : i32
    %c0_i32_163 = arith.constant 0 : i32
    %185 = tpu.memref_slice %arg1[%c8_i32_159, %c0_i32_162, %c0_i32_163] : memref<12x128x128xbf16, #tpu.memory_space<any>> -> memref<1x128x128xbf16, #tpu.memory_space<any>>
    %186 = tpu.memref_squeeze %185 : memref<1x128x128xbf16, #tpu.memory_space<any>> -> memref<128x128xbf16, #tpu.memory_space<any>>
    %c0_i32_164 = arith.constant 0 : i32
    %c0_i32_165 = arith.constant 0 : i32
    %187 = tpu.memref_slice %arg5[%c0_i32_160, %c0_i32_164, %c0_i32_165] : memref<2x128x128xbf16, #tpu.memory_space<vmem>> -> memref<1x128x128xbf16, #tpu.memory_space<vmem>>
    %188 = tpu.memref_squeeze %187 : memref<1x128x128xbf16, #tpu.memory_space<vmem>> -> memref<128x128xbf16, #tpu.memory_space<vmem>>
    %189 = tpu.memref_slice %arg6[%c0_i32_161] : memref<2x!tpu.dma_semaphore, #tpu.memory_space<semaphore_mem>> -> memref<1x!tpu.dma_semaphore, #tpu.memory_space<semaphore_mem>>
    %190 = tpu.memref_squeeze %189 : memref<1x!tpu.dma_semaphore, #tpu.memory_space<semaphore_mem>> -> memref<!tpu.dma_semaphore, #tpu.memory_space<semaphore_mem>>
    tpu.wait_dma2 semaphore(%190 : memref<!tpu.dma_semaphore, #tpu.memory_space<semaphore_mem>>) src(%186 : memref<128x128xbf16, #tpu.memory_space<any>>) dst(%188 : memref<128x128xbf16, #tpu.memory_space<vmem>>)
    %c9_i32 = arith.constant 9 : i32
    %c1_i32_166 = arith.constant 1 : i32
    %c1_i32_167 = arith.constant 1 : i32
    %c0_i32_168 = arith.constant 0 : i32
    %c0_i32_169 = arith.constant 0 : i32
    %191 = tpu.memref_slice %arg1[%c9_i32, %c0_i32_168, %c0_i32_169] : memref<12x128x128xbf16, #tpu.memory_space<any>> -> memref<1x128x128xbf16, #tpu.memory_space<any>>
    %192 = tpu.memref_squeeze %191 : memref<1x128x128xbf16, #tpu.memory_space<any>> -> memref<128x128xbf16, #tpu.memory_space<any>>
    %c0_i32_170 = arith.constant 0 : i32
    %c0_i32_171 = arith.constant 0 : i32
    %193 = tpu.memref_slice %arg5[%c1_i32_166, %c0_i32_170, %c0_i32_171] : memref<2x128x128xbf16, #tpu.memory_space<vmem>> -> memref<1x128x128xbf16, #tpu.memory_space<vmem>>
    %194 = tpu.memref_squeeze %193 : memref<1x128x128xbf16, #tpu.memory_space<vmem>> -> memref<128x128xbf16, #tpu.memory_space<vmem>>
    %195 = tpu.memref_slice %arg6[%c1_i32_167] : memref<2x!tpu.dma_semaphore, #tpu.memory_space<semaphore_mem>> -> memref<1x!tpu.dma_semaphore, #tpu.memory_space<semaphore_mem>>
    %196 = tpu.memref_squeeze %195 : memref<1x!tpu.dma_semaphore, #tpu.memory_space<semaphore_mem>> -> memref<!tpu.dma_semaphore, #tpu.memory_space<semaphore_mem>>
    tpu.enqueue_dma source(%192 : memref<128x128xbf16, #tpu.memory_space<any>>) target(%194 : memref<128x128xbf16, #tpu.memory_space<vmem>>) target_semaphore(%196 : memref<!tpu.dma_semaphore, #tpu.memory_space<semaphore_mem>>)
    %c0_172 = arith.constant 0 : index
    %c0_173 = arith.constant 0 : index
    %c0_174 = arith.constant 0 : index
    %197 = vector.load %arg5[%c0_172, %c0_173, %c0_174] : memref<2x128x128xbf16, #tpu.memory_space<vmem>>, vector<1x128x128xbf16>
    %198 = vector.shape_cast %197 : vector<1x128x128xbf16> to vector<128x128xbf16>
    %199 = arith.truncf %184 : vector<8x128xf32> to vector<8x128xbf16>
    %cst_175 = arith.constant dense<0.000000e+00> : vector<8x128xf32>
    %200 = tpu.matmul %199, %198, %cst_175 {dimension_numbers = #tpu.dot_dimension_numbers<[1], [0], [0], [1], [0, 0, 1, 1], [], []>} : vector<8x128xbf16>, vector<128x128xbf16>, vector<8x128xf32> -> vector<8x128xf32>
    %c7 = arith.constant 7 : index
    %c0_176 = arith.constant 0 : index
    %201 = vector.load %arg2[%c7, %c0_176] : memref<11x128xf32, #tpu.memory_space<vmem>>, vector<1x128xf32>
    %202 = vector.broadcast %201 : vector<1x128xf32> to vector<8x128xf32>
    %203 = arith.addf %200, %202 : vector<8x128xf32>
    %cst_177 = arith.constant 0.000000e+00 : f32
    %204 = vector.broadcast %cst_177 : f32 to vector<8x128xf32>
    %205 = arith.maximumf %203, %204 : vector<8x128xf32>
    %c9_i32_178 = arith.constant 9 : i32
    %c1_i32_179 = arith.constant 1 : i32
    %c1_i32_180 = arith.constant 1 : i32
    %c0_i32_181 = arith.constant 0 : i32
    %c0_i32_182 = arith.constant 0 : i32
    %206 = tpu.memref_slice %arg1[%c9_i32_178, %c0_i32_181, %c0_i32_182] : memref<12x128x128xbf16, #tpu.memory_space<any>> -> memref<1x128x128xbf16, #tpu.memory_space<any>>
    %207 = tpu.memref_squeeze %206 : memref<1x128x128xbf16, #tpu.memory_space<any>> -> memref<128x128xbf16, #tpu.memory_space<any>>
    %c0_i32_183 = arith.constant 0 : i32
    %c0_i32_184 = arith.constant 0 : i32
    %208 = tpu.memref_slice %arg5[%c1_i32_179, %c0_i32_183, %c0_i32_184] : memref<2x128x128xbf16, #tpu.memory_space<vmem>> -> memref<1x128x128xbf16, #tpu.memory_space<vmem>>
    %209 = tpu.memref_squeeze %208 : memref<1x128x128xbf16, #tpu.memory_space<vmem>> -> memref<128x128xbf16, #tpu.memory_space<vmem>>
    %210 = tpu.memref_slice %arg6[%c1_i32_180] : memref<2x!tpu.dma_semaphore, #tpu.memory_space<semaphore_mem>> -> memref<1x!tpu.dma_semaphore, #tpu.memory_space<semaphore_mem>>
    %211 = tpu.memref_squeeze %210 : memref<1x!tpu.dma_semaphore, #tpu.memory_space<semaphore_mem>> -> memref<!tpu.dma_semaphore, #tpu.memory_space<semaphore_mem>>
    tpu.wait_dma2 semaphore(%211 : memref<!tpu.dma_semaphore, #tpu.memory_space<semaphore_mem>>) src(%207 : memref<128x128xbf16, #tpu.memory_space<any>>) dst(%209 : memref<128x128xbf16, #tpu.memory_space<vmem>>)
    %c10_i32 = arith.constant 10 : i32
    %c0_i32_185 = arith.constant 0 : i32
    %c0_i32_186 = arith.constant 0 : i32
    %c0_i32_187 = arith.constant 0 : i32
    %c0_i32_188 = arith.constant 0 : i32
    %212 = tpu.memref_slice %arg1[%c10_i32, %c0_i32_187, %c0_i32_188] : memref<12x128x128xbf16, #tpu.memory_space<any>> -> memref<1x128x128xbf16, #tpu.memory_space<any>>
    %213 = tpu.memref_squeeze %212 : memref<1x128x128xbf16, #tpu.memory_space<any>> -> memref<128x128xbf16, #tpu.memory_space<any>>
    %c0_i32_189 = arith.constant 0 : i32
    %c0_i32_190 = arith.constant 0 : i32
    %214 = tpu.memref_slice %arg5[%c0_i32_185, %c0_i32_189, %c0_i32_190] : memref<2x128x128xbf16, #tpu.memory_space<vmem>> -> memref<1x128x128xbf16, #tpu.memory_space<vmem>>
    %215 = tpu.memref_squeeze %214 : memref<1x128x128xbf16, #tpu.memory_space<vmem>> -> memref<128x128xbf16, #tpu.memory_space<vmem>>
    %216 = tpu.memref_slice %arg6[%c0_i32_186] : memref<2x!tpu.dma_semaphore, #tpu.memory_space<semaphore_mem>> -> memref<1x!tpu.dma_semaphore, #tpu.memory_space<semaphore_mem>>
    %217 = tpu.memref_squeeze %216 : memref<1x!tpu.dma_semaphore, #tpu.memory_space<semaphore_mem>> -> memref<!tpu.dma_semaphore, #tpu.memory_space<semaphore_mem>>
    tpu.enqueue_dma source(%213 : memref<128x128xbf16, #tpu.memory_space<any>>) target(%215 : memref<128x128xbf16, #tpu.memory_space<vmem>>) target_semaphore(%217 : memref<!tpu.dma_semaphore, #tpu.memory_space<semaphore_mem>>)
    %c1_191 = arith.constant 1 : index
    %c0_192 = arith.constant 0 : index
    %c0_193 = arith.constant 0 : index
    %218 = vector.load %arg5[%c1_191, %c0_192, %c0_193] : memref<2x128x128xbf16, #tpu.memory_space<vmem>>, vector<1x128x128xbf16>
    %219 = vector.shape_cast %218 : vector<1x128x128xbf16> to vector<128x128xbf16>
    %220 = arith.truncf %205 : vector<8x128xf32> to vector<8x128xbf16>
    %cst_194 = arith.constant dense<0.000000e+00> : vector<8x128xf32>
    %221 = tpu.matmul %220, %219, %cst_194 {dimension_numbers = #tpu.dot_dimension_numbers<[1], [0], [0], [1], [0, 0, 1, 1], [], []>} : vector<8x128xbf16>, vector<128x128xbf16>, vector<8x128xf32> -> vector<8x128xf32>
    %c8 = arith.constant 8 : index
    %c0_195 = arith.constant 0 : index
    %222 = vector.load %arg2[%c8, %c0_195] : memref<11x128xf32, #tpu.memory_space<vmem>>, vector<1x128xf32>
    %223 = vector.broadcast %222 : vector<1x128xf32> to vector<8x128xf32>
    %224 = arith.addf %221, %223 : vector<8x128xf32>
    %cst_196 = arith.constant 0.000000e+00 : f32
    %225 = vector.broadcast %cst_196 : f32 to vector<8x128xf32>
    %226 = arith.maximumf %224, %225 : vector<8x128xf32>
    %c10_i32_197 = arith.constant 10 : i32
    %c0_i32_198 = arith.constant 0 : i32
    %c0_i32_199 = arith.constant 0 : i32
    %c0_i32_200 = arith.constant 0 : i32
    %c0_i32_201 = arith.constant 0 : i32
    %227 = tpu.memref_slice %arg1[%c10_i32_197, %c0_i32_200, %c0_i32_201] : memref<12x128x128xbf16, #tpu.memory_space<any>> -> memref<1x128x128xbf16, #tpu.memory_space<any>>
    %228 = tpu.memref_squeeze %227 : memref<1x128x128xbf16, #tpu.memory_space<any>> -> memref<128x128xbf16, #tpu.memory_space<any>>
    %c0_i32_202 = arith.constant 0 : i32
    %c0_i32_203 = arith.constant 0 : i32
    %229 = tpu.memref_slice %arg5[%c0_i32_198, %c0_i32_202, %c0_i32_203] : memref<2x128x128xbf16, #tpu.memory_space<vmem>> -> memref<1x128x128xbf16, #tpu.memory_space<vmem>>
    %230 = tpu.memref_squeeze %229 : memref<1x128x128xbf16, #tpu.memory_space<vmem>> -> memref<128x128xbf16, #tpu.memory_space<vmem>>
    %231 = tpu.memref_slice %arg6[%c0_i32_199] : memref<2x!tpu.dma_semaphore, #tpu.memory_space<semaphore_mem>> -> memref<1x!tpu.dma_semaphore, #tpu.memory_space<semaphore_mem>>
    %232 = tpu.memref_squeeze %231 : memref<1x!tpu.dma_semaphore, #tpu.memory_space<semaphore_mem>> -> memref<!tpu.dma_semaphore, #tpu.memory_space<semaphore_mem>>
    tpu.wait_dma2 semaphore(%232 : memref<!tpu.dma_semaphore, #tpu.memory_space<semaphore_mem>>) src(%228 : memref<128x128xbf16, #tpu.memory_space<any>>) dst(%230 : memref<128x128xbf16, #tpu.memory_space<vmem>>)
    %c11_i32 = arith.constant 11 : i32
    %c1_i32_204 = arith.constant 1 : i32
    %c1_i32_205 = arith.constant 1 : i32
    %c0_i32_206 = arith.constant 0 : i32
    %c0_i32_207 = arith.constant 0 : i32
    %233 = tpu.memref_slice %arg1[%c11_i32, %c0_i32_206, %c0_i32_207] : memref<12x128x128xbf16, #tpu.memory_space<any>> -> memref<1x128x128xbf16, #tpu.memory_space<any>>
    %234 = tpu.memref_squeeze %233 : memref<1x128x128xbf16, #tpu.memory_space<any>> -> memref<128x128xbf16, #tpu.memory_space<any>>
    %c0_i32_208 = arith.constant 0 : i32
    %c0_i32_209 = arith.constant 0 : i32
    %235 = tpu.memref_slice %arg5[%c1_i32_204, %c0_i32_208, %c0_i32_209] : memref<2x128x128xbf16, #tpu.memory_space<vmem>> -> memref<1x128x128xbf16, #tpu.memory_space<vmem>>
    %236 = tpu.memref_squeeze %235 : memref<1x128x128xbf16, #tpu.memory_space<vmem>> -> memref<128x128xbf16, #tpu.memory_space<vmem>>
    %237 = tpu.memref_slice %arg6[%c1_i32_205] : memref<2x!tpu.dma_semaphore, #tpu.memory_space<semaphore_mem>> -> memref<1x!tpu.dma_semaphore, #tpu.memory_space<semaphore_mem>>
    %238 = tpu.memref_squeeze %237 : memref<1x!tpu.dma_semaphore, #tpu.memory_space<semaphore_mem>> -> memref<!tpu.dma_semaphore, #tpu.memory_space<semaphore_mem>>
    tpu.enqueue_dma source(%234 : memref<128x128xbf16, #tpu.memory_space<any>>) target(%236 : memref<128x128xbf16, #tpu.memory_space<vmem>>) target_semaphore(%238 : memref<!tpu.dma_semaphore, #tpu.memory_space<semaphore_mem>>)
    %c0_210 = arith.constant 0 : index
    %c0_211 = arith.constant 0 : index
    %c0_212 = arith.constant 0 : index
    %239 = vector.load %arg5[%c0_210, %c0_211, %c0_212] : memref<2x128x128xbf16, #tpu.memory_space<vmem>>, vector<1x128x128xbf16>
    %240 = vector.shape_cast %239 : vector<1x128x128xbf16> to vector<128x128xbf16>
    %241 = arith.truncf %226 : vector<8x128xf32> to vector<8x128xbf16>
    %cst_213 = arith.constant dense<0.000000e+00> : vector<8x128xf32>
    %242 = tpu.matmul %241, %240, %cst_213 {dimension_numbers = #tpu.dot_dimension_numbers<[1], [0], [0], [1], [0, 0, 1, 1], [], []>} : vector<8x128xbf16>, vector<128x128xbf16>, vector<8x128xf32> -> vector<8x128xf32>
    %c9 = arith.constant 9 : index
    %c0_214 = arith.constant 0 : index
    %243 = vector.load %arg2[%c9, %c0_214] : memref<11x128xf32, #tpu.memory_space<vmem>>, vector<1x128xf32>
    %244 = vector.broadcast %243 : vector<1x128xf32> to vector<8x128xf32>
    %245 = arith.addf %242, %244 : vector<8x128xf32>
    %cst_215 = arith.constant 0.000000e+00 : f32
    %246 = vector.broadcast %cst_215 : f32 to vector<8x128xf32>
    %247 = arith.maximumf %245, %246 : vector<8x128xf32>
    %c11_i32_216 = arith.constant 11 : i32
    %c1_i32_217 = arith.constant 1 : i32
    %c1_i32_218 = arith.constant 1 : i32
    %c0_i32_219 = arith.constant 0 : i32
    %c0_i32_220 = arith.constant 0 : i32
    %248 = tpu.memref_slice %arg1[%c11_i32_216, %c0_i32_219, %c0_i32_220] : memref<12x128x128xbf16, #tpu.memory_space<any>> -> memref<1x128x128xbf16, #tpu.memory_space<any>>
    %249 = tpu.memref_squeeze %248 : memref<1x128x128xbf16, #tpu.memory_space<any>> -> memref<128x128xbf16, #tpu.memory_space<any>>
    %c0_i32_221 = arith.constant 0 : i32
    %c0_i32_222 = arith.constant 0 : i32
    %250 = tpu.memref_slice %arg5[%c1_i32_217, %c0_i32_221, %c0_i32_222] : memref<2x128x128xbf16, #tpu.memory_space<vmem>> -> memref<1x128x128xbf16, #tpu.memory_space<vmem>>
    %251 = tpu.memref_squeeze %250 : memref<1x128x128xbf16, #tpu.memory_space<vmem>> -> memref<128x128xbf16, #tpu.memory_space<vmem>>
    %252 = tpu.memref_slice %arg6[%c1_i32_218] : memref<2x!tpu.dma_semaphore, #tpu.memory_space<semaphore_mem>> -> memref<1x!tpu.dma_semaphore, #tpu.memory_space<semaphore_mem>>
    %253 = tpu.memref_squeeze %252 : memref<1x!tpu.dma_semaphore, #tpu.memory_space<semaphore_mem>> -> memref<!tpu.dma_semaphore, #tpu.memory_space<semaphore_mem>>
    tpu.wait_dma2 semaphore(%253 : memref<!tpu.dma_semaphore, #tpu.memory_space<semaphore_mem>>) src(%249 : memref<128x128xbf16, #tpu.memory_space<any>>) dst(%251 : memref<128x128xbf16, #tpu.memory_space<vmem>>)
    %c1_223 = arith.constant 1 : index
    %c0_224 = arith.constant 0 : index
    %c0_225 = arith.constant 0 : index
    %254 = vector.load %arg5[%c1_223, %c0_224, %c0_225] : memref<2x128x128xbf16, #tpu.memory_space<vmem>>, vector<1x128x128xbf16>
    %255 = vector.shape_cast %254 : vector<1x128x128xbf16> to vector<128x128xbf16>
    %256 = arith.truncf %247 : vector<8x128xf32> to vector<8x128xbf16>
    %cst_226 = arith.constant dense<0.000000e+00> : vector<8x128xf32>
    %257 = tpu.matmul %256, %255, %cst_226 {dimension_numbers = #tpu.dot_dimension_numbers<[1], [0], [0], [1], [0, 0, 1, 1], [], []>} : vector<8x128xbf16>, vector<128x128xbf16>, vector<8x128xf32> -> vector<8x128xf32>
    %c10 = arith.constant 10 : index
    %c0_227 = arith.constant 0 : index
    %258 = vector.load %arg2[%c10, %c0_227] : memref<11x128xf32, #tpu.memory_space<vmem>>, vector<1x128xf32>
    %259 = vector.broadcast %258 : vector<1x128xf32> to vector<8x128xf32>
    %260 = arith.addf %257, %259 : vector<8x128xf32>
    %261 = tpu.iota {dimensions = array<i32: 1>} : vector<8x128xi32>
    %c16_i32_228 = arith.constant 16 : i32
    %262 = vector.broadcast %c16_i32_228 : i32 to vector<8x128xi32>
    %263 = arith.cmpi slt, %261, %262 : vector<8x128xi32>
    %cst_229 = arith.constant 0xFF800000 : f32
    %264 = vector.broadcast %cst_229 : f32 to vector<8x128xf32>
    %265 = arith.select %263, %260, %264 : vector<8x128xi1>, vector<8x128xf32>
    %cst_230 = arith.constant dense<0xFF800000> : vector<8xf32>
    %266 = vector.multi_reduction <maximumf>, %265, %cst_230 [1] : vector<8x128xf32> to vector<8xf32>
    %267 = vector.shape_cast %266 : vector<8xf32> to vector<8x1xf32>
    %268 = vector.broadcast %267 : vector<8x1xf32> to vector<8x128xf32>
    %269 = arith.subf %265, %268 : vector<8x128xf32>
    %270 = math.exp %269 : vector<8x128xf32>
    %cst_231 = arith.constant dense<0.000000e+00> : vector<8xf32>
    %271 = vector.multi_reduction <add>, %270, %cst_231 [1] : vector<8x128xf32> to vector<8xf32>
    %272 = vector.shape_cast %271 : vector<8xf32> to vector<8x1xf32>
    %273 = tpu.reciprocal %272 {approx = true} : vector<8x1xf32> -> vector<8x1xf32>
    %274 = vector.broadcast %273 : vector<8x1xf32> to vector<8x128xf32>
    %275 = arith.mulf %270, %274 : vector<8x128xf32>
    %c0_232 = arith.constant 0 : index
    %c0_233 = arith.constant 0 : index
    %276 = vector.load %arg3[%c0_232, %c0_233] : memref<8x128xf32, #tpu.memory_space<vmem>>, vector<8x128xf32>
    tpu.vector_store %arg3[%c0_232, %c0_233], %146 {strides = array<i32>} : memref<8x128xf32, #tpu.memory_space<vmem>>, vector<8x128xf32>,
    %c0_234 = arith.constant 0 : index
    %c0_235 = arith.constant 0 : index
    %277 = vector.load %arg4[%c0_234, %c0_235] : memref<8x128xf32, #tpu.memory_space<vmem>>, vector<8x128xf32>
    tpu.vector_store %arg4[%c0_234, %c0_235], %275 {strides = array<i32>} : memref<8x128xf32, #tpu.memory_space<vmem>>, vector<8x128xf32>,
    return
  }
}

</mosaic_0001>

<bundles_post_ra>
// kernel: forward.1
= control target key start
LH: loop header
LB: loop body
LE: loop exit
PB: predicated region body
PF: predicated region fallthrough
CT: control target
= control target key end

     0   :  { %10 = vsyncpa [#allocation5], 0  ;;  %s2758_s0 = inlined_call_operand.hbm [shape: f32[8,32], index: 0, kind: input, shape index: {}]   ;;  %s2759_s1 = inlined_call_operand.hbm [shape: bf16[12,128,128], index: 1, kind: input, shape index: {}]   ;;  %s2760_s2 = inlined_call_operand.hbm [shape: f32[11,128], index: 2, kind: input, shape index: {}]   ;;  %s2761_s3 = inlined_call_operand.hbm [shape: f32[8,128], index: 3, kind: output, shape index: {0}]   ;;  %s2762_s4 = inlined_call_operand.hbm [shape: f32[8,128], index: 4, kind: output, shape index: {1}]  }
   0x1   :  { %11 = vsyncpa [#allocation8], 0 }
   0x2   :  { %12 = vsyncpa [#allocation6], 0 }
   0x3   :  { %13 = vsyncpa [#allocation11], 0  ;;  %s2482_s15 = smov [#allocation4]   ;;  %s2483_s17 = smov [#allocation7]  }
   0x4   :  { %s20_s16 = sshll.u32 %s2482_s15, 4  ;;  %s29_s18 = sshll.u32 %s2483_s17, 4  ;;  %s21_s16 = int_to_ptr.vmem [resolvable:$true] %s20_s16  ;;  %s30_s18 = int_to_ptr.vmem [resolvable:$true] %s29_s18 }
   0x5   :  { %s2105_s19 = scalar_lea.vmem %s21_s16, 128  ;;  %p2110_p1 = scmp.lt.s32.totalorder %s21_s16, %s21_s16 }
   0x6   :  { %p2106_p0 = scmp.ne.s32.totalorder %s21_s16, %s2105_s19  ;;  %p2111_p2 = scmp.lt.s32.totalorder %s2105_s19, %s2105_s19 }
   0x8   :  { %p2112_p3 = por %p2111_p2, %p2110_p1 }
   0xa   :  { %p2113_p4 = pnand %p2112_p3, %p2106_p0 }
   0xc   :  { %2116 = shalt.err (!%p2113_p4)
}
   0xd   :  { %23 = dma.hbm_to_vmem [thread:$0]  %s2758_s0, 128, %s21_s16, [#allocation5]  }
   0xe   :  { %s2125_s22 = scalar_lea.vmem %s30_s18, 256  ;;  %p2130_p6 = scmp.lt.s32.totalorder %s30_s18, %s30_s18 }
   0xf   :  { %p2126_p5 = scmp.ne.s32.totalorder %s30_s18, %s2125_s22  ;;  %p2131_p7 = scmp.lt.s32.totalorder %s2125_s22, %s2125_s22 }
  0x11   :  { %p2132_p8 = por %p2131_p7, %p2130_p6 }
  0x13   :  { %p2133_p9 = pnand %p2132_p8, %p2126_p5 }
  0x15   :  { %2136 = shalt.err (!%p2133_p9)
}
  0x16   :  { %s2484_s23 = smov 128   ;;  %s2485_s24 = smov 8  }
  0x17   :  { %35 = dma.hbm_to_vmem [thread:$0]  %s2760_s2, 256, %s30_s18, [#allocation8], %s2484_s23, %s2484_s23, %s2485_s24  }
  0x18   :  { %2450 = dma.done.wait [#allocation5], 128  }
  0x19   :  { %2451 = vsyncadd [#allocation5], 4294967168 }
  0x1a   :  { %2452 = dma.done.wait [#allocation8], 256  }
  0x1b   :  { %2453 = vsyncadd [#allocation8], 4294967040  ;;  %s2486_s27 = smov [#allocation2]  }
  0x1c   :  { %s50_s28 = sshll.u32 %s2486_s27, 4  ;;  %s2523_s28 = int_to_ptr.vmem [resolvable:$true] %s50_s28 }
  0x1d   :  { %s2145_s0 = scalar_lea.vmem %s2523_s28, 1024  ;;  %s2149_s29 = scalar_lea.vmem %s2523_s28, 2048 }
  0x1e   :  { %p2146_p10 = scmp.ne.s32.totalorder %s2523_s28, %s2145_s0  ;;  %p2150_p11 = scmp.lt.s32.totalorder %s2523_s28, %s2523_s28 }
  0x1f   :  { %p2151_p12 = scmp.lt.s32.totalorder %s2149_s29, %s2145_s0 }
  0x21   :  { %p2152_p13 = por %p2151_p12, %p2150_p11 }
  0x23   :  { %p2530_p0 = pnand %p2152_p13, %p2146_p10 }
  0x25   :  { %2156 = shalt.err (!%p2530_p0)  }
  0x26   :  { %53 = dma.hbm_to_vmem [thread:$0]  %s2759_s1, 1024, %s2523_s28, [#allocation3] }
  0x27   :  { %2454 = dma.done.wait [#allocation3], 1024 }
  0x28   :  { %2455 = vsyncadd [#allocation3], 4294966272  ;;  %s58_s8 = scalar_lea.hbm %s2759_s1, 1024  ;;  %s2487_s9 = smov [#allocation2 + $0x40]   ;;  %v2488_v0 = vmov 0.0   ;;  %vm2489_vm0 = vmmov 0  }
  0x29   :  { %s68_s10 = sshll.u32 %s2487_s9, 4  ;;  %1769 = vmatprep.subr.bf16.mxu0 %v2488_v0  ;;  %1773 = vmatprep.mubr.msk.bf16.mxu0 %vm2489_vm0, %v2488_v0  ;;  %s2546_s10 = int_to_ptr.vmem [resolvable:$true] %s68_s10 }
  0x2a   :  { %s2167_s11 = scalar_lea.vmem %s2546_s10, 1024  ;;  %p2172_p2 = scmp.lt.s32.totalorder %s2546_s10, %s2523_s28 }
  0x2b   :  { %p2168_p1 = scmp.ne.s32.totalorder %s2546_s10, %s2167_s11  ;;  %p2173_p3 = scmp.lt.s32.totalorder %s2149_s29, %s2167_s11 }
  0x2d   :  { %p2174_p4 = por %p2173_p3, %p2172_p2 }
  0x2f   :  { %p2552_p5 = pnand %p2174_p4, %p2168_p1 }
  0x31   :  { %2178 = shalt.err (!%p2552_p5)  }
  0x32   :  { %71 = dma.hbm_to_vmem [thread:$0]  %s58_s8, 1024, %s2546_s10, [#allocation3 + $0x1]  ;;  %v76_v3 = vld [vmem:[#allocation4] sm:$0xff]  ;;  %vm95_vm1 = vcmask 261120   ;;  %v1563_v5 = vld [vmem:[#allocation7] ss:$0 sm:$0xff] }
  0x33   :  { %v2007_v1 = vld [vmem:[#allocation2 + $0x8] sm:$0xff]   ;;  %v2008_v2 = vld [vmem:[#allocation2] sm:$0xff]   ;;  %v77_v4 = vpack.c.bf16 %v76_v3, %v76_v3 }
  0x34   :  { %1770 = vmatpush3.bf16.msra.mxu0 %v2007_v1 }
  0x35   :  { %1771 = vmatprep.subr.bf16.mxu0 %v2488_v0 }
  0x38   :  { %1772 = vmatpush3.bf16.msra.mxu0 %v2008_v2 }
  0x3b   :  { %1774 = vmatmul.mubr.msk.bf16.vlgmr.msra.gmra.mxu0 %vm95_vm1, %v77_v4 }
  0xfb   :  { %v133_v6 = vpop.f32.mrf.mxu0 }
  0xfc   :  { %v134_v7 = vadd.f32 %v1563_v5, %v133_v6 }
  0xfd   :  { %v1775_v8 = vpop.f32.mrf.mxu0 }
  0xfe   :  { %v139_v9 = vmax.f32 %v134_v7, 0.0 }
  0xff   :  { %v136_v10 = vpop.f32.mrf.mxu0 }
 0x101   :  { %v1776_v11 = vpop.f32.mrf.mxu0 }
 0x102   :  { %2456 = dma.done.wait [#allocation3 + $0x1], 1024 }
 0x103   :  { %2457 = vsyncadd [#allocation3 + $0x1], 4294966272  ;;  %s142_s15 = scalar_lea.hbm %s2759_s1, 2048  ;;  %1777 = vmatprep.subr.bf16.mxu1 %v2488_v0  ;;  %1793 = vmatprep.mubr.msk.bf16.mxu1 %vm2489_vm0, %v2488_v0 }
 0x104   :  { %2201 = shalt.err (!%p2530_p0)  }
 0x105   :  { %153 = dma.hbm_to_vmem [thread:$0]  %s142_s15, 1024, %s2523_s28, [#allocation3]  ;;  %v2576_v20 = vpack.c.bf16 %v139_v9, %v139_v9  ;;  %v1567_v21 = vld [vmem:[#allocation7 + $0x1] ss:$0 sm:$0xff] }
 0x106   :  { %v2009_v12 = vld [vmem:[#allocation2 + $0x78] sm:$0xff]   ;;  %v2010_v13 = vld [vmem:[#allocation2 + $0x70] sm:$0xff]   ;;  %v2011_v14 = vld [vmem:[#allocation2 + $0x68] sm:$0xff]  }
 0x107   :  { %1778 = vmatpush3.bf16.msra.mxu1 %v2009_v12  ;;  %v2012_v15 = vld [vmem:[#allocation2 + $0x60] sm:$0xff]   ;;  %v2013_v16 = vld [vmem:[#allocation2 + $0x58] sm:$0xff]   ;;  %v2014_v17 = vld [vmem:[#allocation2 + $0x50] sm:$0xff]  }
 0x108   :  { %1779 = vmatprep.subr.bf16.mxu1 %v2488_v0  ;;  %v2015_v18 = vld [vmem:[#allocation2 + $0x48] sm:$0xff]   ;;  %v2016_v19 = vld [vmem:[#allocation2 + $0x40] sm:$0xff]  }
 0x10b   :  { %1780 = vmatpush3.bf16.msra.mxu1 %v2010_v13 }
 0x10c   :  { %1781 = vmatprep.subr.bf16.mxu1 %v2488_v0 }
 0x10f   :  { %1782 = vmatpush3.bf16.msra.mxu1 %v2011_v14 }
 0x110   :  { %1783 = vmatprep.subr.bf16.mxu1 %v2488_v0 }
 0x113   :  { %1784 = vmatpush3.bf16.msra.mxu1 %v2012_v15 }
 0x114   :  { %1785 = vmatprep.subr.bf16.mxu1 %v2488_v0 }
 0x117   :  { %1786 = vmatpush3.bf16.msra.mxu1 %v2013_v16 }
 0x118   :  { %1787 = vmatprep.subr.bf16.mxu1 %v2488_v0 }
 0x11b   :  { %1788 = vmatpush3.bf16.msra.mxu1 %v2014_v17 }
 0x11c   :  { %1789 = vmatprep.subr.bf16.mxu1 %v2488_v0 }
 0x11f   :  { %1790 = vmatpush3.bf16.msra.mxu1 %v2015_v18 }
 0x120   :  { %1791 = vmatprep.subr.bf16.mxu1 %v2488_v0 }
 0x123   :  { %1792 = vmatpush3.bf16.msra.mxu1 %v2016_v19 }
 0x126   :  { %1794 = vmatmul.mubr.bf16.vlgmr.msra.gmra.mxu1 %v2576_v20 }
 0x1e6   :  { %v258_v22 = vpop.f32.mrf.mxu1 }
 0x1e7   :  { %v259_v23 = vadd.f32 %v1567_v21, %v258_v22 }
 0x1e8   :  { %v1795_v24 = vpop.f32.mrf.mxu1 }
 0x1e9   :  { %v264_v25 = vmax.f32 %v259_v23, 0.0 }
 0x1ea   :  { %v261_v26 = vpop.f32.mrf.mxu1 }
 0x1ec   :  { %v1796_v27 = vpop.f32.mrf.mxu1 }
 0x1ed   :  { %2458 = dma.done.wait [#allocation3], 1024 }
 0x1ee   :  { %2459 = vsyncadd [#allocation3], 4294966272  ;;  %s267_s18 = scalar_lea.hbm %s2759_s1, 3072  ;;  %1797 = vmatprep.subr.bf16.mxu0 %v2488_v0  ;;  %1813 = vmatprep.mubr.msk.bf16.mxu0 %vm2489_vm0, %v2488_v0 }
 0x1ef   :  { %2224 = shalt.err (!%p2552_p5)  }
 0x1f0   :  { %278 = dma.hbm_to_vmem [thread:$0]  %s267_s18, 1024, %s2546_s10, [#allocation3 + $0x1]  ;;  %v295_v36 = vpack.c.bf16 %v264_v25, %v264_v25  ;;  %v1576_v37 = vld [vmem:[#allocation7 + $0x2] ss:$0 sm:$0xff] }
 0x1f1   :  { %v2017_v28 = vld [vmem:[#allocation2 + $0x38] sm:$0xff]   ;;  %v2018_v29 = vld [vmem:[#allocation2 + $0x30] sm:$0xff]   ;;  %v2019_v30 = vld [vmem:[#allocation2 + $0x28] sm:$0xff]  }
 0x1f2   :  { %1798 = vmatpush3.bf16.msra.mxu0 %v2017_v28  ;;  %v2020_v31 = vld [vmem:[#allocation2 + $0x20] sm:$0xff]   ;;  %v2021_v32 = vld [vmem:[#allocation2 + $0x18] sm:$0xff]   ;;  %v2022_v33 = vld [vmem:[#allocation2 + $0x10] sm:$0xff]  }
 0x1f3   :  { %1799 = vmatprep.subr.bf16.mxu0 %v2488_v0  ;;  %v2023_v34 = vld [vmem:[#allocation2 + $0x8] sm:$0xff]   ;;  %v2024_v35 = vld [vmem:[#allocation2] sm:$0xff]  }
 0x1f6   :  { %1800 = vmatpush3.bf16.msra.mxu0 %v2018_v29 }
 0x1f7   :  { %1801 = vmatprep.subr.bf16.mxu0 %v2488_v0 }
 0x1fa   :  { %1802 = vmatpush3.bf16.msra.mxu0 %v2019_v30 }
 0x1fb   :  { %1803 = vmatprep.subr.bf16.mxu0 %v2488_v0 }
 0x1fe   :  { %1804 = vmatpush3.bf16.msra.mxu0 %v2020_v31 }
 0x1ff   :  { %1805 = vmatprep.subr.bf16.mxu0 %v2488_v0 }
 0x202   :  { %1806 = vmatpush3.bf16.msra.mxu0 %v2021_v32 }
 0x203   :  { %1807 = vmatprep.subr.bf16.mxu0 %v2488_v0 }
 0x206   :  { %1808 = vmatpush3.bf16.msra.mxu0 %v2022_v33 }
 0x207   :  { %1809 = vmatprep.subr.bf16.mxu0 %v2488_v0 }
 0x20a   :  { %1810 = vmatpush3.bf16.msra.mxu0 %v2023_v34 }
 0x20b   :  { %1811 = vmatprep.subr.bf16.mxu0 %v2488_v0 }
 0x20e   :  { %1812 = vmatpush3.bf16.msra.mxu0 %v2024_v35 }
 0x211   :  { %1814 = vmatmul.mubr.bf16.vlgmr.msra.gmra.mxu0 %v295_v36 }
 0x2d1   :  { %v383_v38 = vpop.f32.mrf.mxu0 }
 0x2d2   :  { %v384_v39 = vadd.f32 %v1576_v37, %v383_v38 }
 0x2d3   :  { %v1815_v40 = vpop.f32.mrf.mxu0 }
 0x2d4   :  { %v389_v41 = vmax.f32 %v384_v39, 0.0 }
 0x2d5   :  { %v386_v42 = vpop.f32.mrf.mxu0 }
 0x2d7   :  { %v1816_v43 = vpop.f32.mrf.mxu0 }
 0x2d8   :  { %2460 = dma.done.wait [#allocation3 + $0x1], 1024 }
 0x2d9   :  { %2461 = vsyncadd [#allocation3 + $0x1], 4294966272  ;;  %s392_s21 = scalar_lea.hbm %s2759_s1, 4096  ;;  %1817 = vmatprep.subr.bf16.mxu1 %v2488_v0  ;;  %1833 = vmatprep.mubr.msk.bf16.mxu1 %vm2489_vm0, %v2488_v0 }
 0x2da   :  { %2247 = shalt.err (!%p2530_p0)  }
 0x2db   :  { %403 = dma.hbm_to_vmem [thread:$0]  %s392_s21, 1024, %s2523_s28, [#allocation3]  ;;  %v420_v52 = vpack.c.bf16 %v389_v41, %v389_v41  ;;  %v1585_v53 = vld [vmem:[#allocation7 + $0x3] ss:$0 sm:$0xff] }
 0x2dc   :  { %v2025_v44 = vld [vmem:[#allocation2 + $0x78] sm:$0xff]   ;;  %v2026_v45 = vld [vmem:[#allocation2 + $0x70] sm:$0xff]   ;;  %v2027_v46 = vld [vmem:[#allocation2 + $0x68] sm:$0xff]  }
 0x2dd   :  { %1818 = vmatpush3.bf16.msra.mxu1 %v2025_v44  ;;  %v2028_v47 = vld [vmem:[#allocation2 + $0x60] sm:$0xff]   ;;  %v2029_v48 = vld [vmem:[#allocation2 + $0x58] sm:$0xff]   ;;  %v2030_v49 = vld [vmem:[#allocation2 + $0x50] sm:$0xff]  }
 0x2de   :  { %1819 = vmatprep.subr.bf16.mxu1 %v2488_v0  ;;  %v2031_v50 = vld [vmem:[#allocation2 + $0x48] sm:$0xff]   ;;  %v2032_v51 = vld [vmem:[#allocation2 + $0x40] sm:$0xff]  }
 0x2e1   :  { %1820 = vmatpush3.bf16.msra.mxu1 %v2026_v45 }
 0x2e2   :  { %1821 = vmatprep.subr.bf16.mxu1 %v2488_v0 }
 0x2e5   :  { %1822 = vmatpush3.bf16.msra.mxu1 %v2027_v46 }
 0x2e6   :  { %1823 = vmatprep.subr.bf16.mxu1 %v2488_v0 }
 0x2e9   :  { %1824 = vmatpush3.bf16.msra.mxu1 %v2028_v47 }
 0x2ea   :  { %1825 = vmatprep.subr.bf16.mxu1 %v2488_v0 }
 0x2ed   :  { %1826 = vmatpush3.bf16.msra.mxu1 %v2029_v48 }
 0x2ee   :  { %1827 = vmatprep.subr.bf16.mxu1 %v2488_v0 }
 0x2f1   :  { %1828 = vmatpush3.bf16.msra.mxu1 %v2030_v49 }
 0x2f2   :  { %1829 = vmatprep.subr.bf16.mxu1 %v2488_v0 }
 0x2f5   :  { %1830 = vmatpush3.bf16.msra.mxu1 %v2031_v50 }
 0x2f6   :  { %1831 = vmatprep.subr.bf16.mxu1 %v2488_v0 }
 0x2f9   :  { %1832 = vmatpush3.bf16.msra.mxu1 %v2032_v51 }
 0x2fc   :  { %1834 = vmatmul.mubr.bf16.vlgmr.msra.gmra.mxu1 %v420_v52 }
 0x3bc   :  { %v508_v54 = vpop.f32.mrf.mxu1 }
 0x3bd   :  { %v509_v55 = vadd.f32 %v1585_v53, %v508_v54 }
 0x3be   :  { %v1835_v56 = vpop.f32.mrf.mxu1 }
 0x3bf   :  { %v514_v57 = vmax.f32 %v509_v55, 0.0 }
 0x3c0   :  { %v511_v58 = vpop.f32.mrf.mxu1 }
 0x3c2   :  { %v1836_v59 = vpop.f32.mrf.mxu1 }
 0x3c3   :  { %2462 = dma.done.wait [#allocation3], 1024 }
 0x3c4   :  { %2463 = vsyncadd [#allocation3], 4294966272  ;;  %s517_s24 = scalar_lea.hbm %s2759_s1, 5120  ;;  %1837 = vmatprep.subr.bf16.mxu0 %v2488_v0  ;;  %1853 = vmatprep.mubr.msk.bf16.mxu0 %vm2489_vm0, %v2488_v0 }
 0x3c5   :  { %2270 = shalt.err (!%p2552_p5)  }
 0x3c6   :  { %528 = dma.hbm_to_vmem [thread:$0]  %s517_s24, 1024, %s2546_s10, [#allocation3 + $0x1]  ;;  %v545_v5 = vpack.c.bf16 %v514_v57, %v514_v57  ;;  %v1594_v6 = vld [vmem:[#allocation7 + $0x4] ss:$0 sm:$0xff] }
 0x3c7   :  { %v2033_v60 = vld [vmem:[#allocation2 + $0x38] sm:$0xff]   ;;  %v2034_v61 = vld [vmem:[#allocation2 + $0x30] sm:$0xff]   ;;  %v2035_v62 = vld [vmem:[#allocation2 + $0x28] sm:$0xff]  }
 0x3c8   :  { %1838 = vmatpush3.bf16.msra.mxu0 %v2033_v60  ;;  %v2036_v63 = vld [vmem:[#allocation2 + $0x20] sm:$0xff]   ;;  %v2037_v1 = vld [vmem:[#allocation2 + $0x18] sm:$0xff]   ;;  %v2038_v2 = vld [vmem:[#allocation2 + $0x10] sm:$0xff]  }
 0x3c9   :  { %1839 = vmatprep.subr.bf16.mxu0 %v2488_v0  ;;  %v2039_v3 = vld [vmem:[#allocation2 + $0x8] sm:$0xff]   ;;  %v2040_v4 = vld [vmem:[#allocation2] sm:$0xff]  }
 0x3cc   :  { %1840 = vmatpush3.bf16.msra.mxu0 %v2034_v61 }
 0x3cd   :  { %1841 = vmatprep.subr.bf16.mxu0 %v2488_v0 }
 0x3d0   :  { %1842 = vmatpush3.bf16.msra.mxu0 %v2035_v62 }
 0x3d1   :  { %1843 = vmatprep.subr.bf16.mxu0 %v2488_v0 }
 0x3d4   :  { %1844 = vmatpush3.bf16.msra.mxu0 %v2036_v63 }
 0x3d5   :  { %1845 = vmatprep.subr.bf16.mxu0 %v2488_v0 }
 0x3d8   :  { %1846 = vmatpush3.bf16.msra.mxu0 %v2037_v1 }
 0x3d9   :  { %1847 = vmatprep.subr.bf16.mxu0 %v2488_v0 }
 0x3dc   :  { %1848 = vmatpush3.bf16.msra.mxu0 %v2038_v2 }
 0x3dd   :  { %1849 = vmatprep.subr.bf16.mxu0 %v2488_v0 }
 0x3e0   :  { %1850 = vmatpush3.bf16.msra.mxu0 %v2039_v3 }
 0x3e1   :  { %1851 = vmatprep.subr.bf16.mxu0 %v2488_v0 }
 0x3e4   :  { %1852 = vmatpush3.bf16.msra.mxu0 %v2040_v4 }
 0x3e7   :  { %1854 = vmatmul.mubr.bf16.vlgmr.msra.gmra.mxu0 %v545_v5 }
 0x4a7   :  { %v633_v7 = vpop.f32.mrf.mxu0 }
 0x4a8   :  { %v634_v8 = vadd.f32 %v1594_v6, %v633_v7 }
 0x4a9   :  { %v1855_v9 = vpop.f32.mrf.mxu0 }
 0x4aa   :  { %v639_v10 = vmax.f32 %v634_v8, 0.0 }
 0x4ab   :  { %v636_v11 = vpop.f32.mrf.mxu0 }
 0x4ad   :  { %v1856_v12 = vpop.f32.mrf.mxu0 }
 0x4ae   :  { %2464 = dma.done.wait [#allocation3 + $0x1], 1024 }
 0x4af   :  { %2465 = vsyncadd [#allocation3 + $0x1], 4294966272  ;;  %s642_s27 = scalar_lea.hbm %s2759_s1, 6144  ;;  %1857 = vmatprep.subr.bf16.mxu1 %v2488_v0  ;;  %1873 = vmatprep.mubr.msk.bf16.mxu1 %vm2489_vm0, %v2488_v0 }
 0x4b0   :  { %2293 = shalt.err (!%p2530_p0)  }
 0x4b1   :  { %653 = dma.hbm_to_vmem [thread:$0]  %s642_s27, 1024, %s2523_s28, [#allocation3]  ;;  %v670_v22 = vpack.c.bf16 %v639_v10, %v639_v10  ;;  %v764_v23 = vlaneseq  ;;  %v1603_v25 = vld [vmem:[#allocation7 + $0x5] ss:$0 sm:$0xff] }
 0x4b2   :  { %v2041_v13 = vld [vmem:[#allocation2 + $0x78] sm:$0xff]   ;;  %v2042_v14 = vld [vmem:[#allocation2 + $0x70] sm:$0xff]   ;;  %v2043_v15 = vld [vmem:[#allocation2 + $0x68] sm:$0xff]  }
 0x4b3   :  { %1858 = vmatpush3.bf16.msra.mxu1 %v2041_v13  ;;  %v2044_v16 = vld [vmem:[#allocation2 + $0x60] sm:$0xff]   ;;  %v2045_v17 = vld [vmem:[#allocation2 + $0x58] sm:$0xff]   ;;  %v2046_v18 = vld [vmem:[#allocation2 + $0x50] sm:$0xff]   ;;  %v2643_v24 = vand.u32 127, %v764_v23 }
 0x4b4   :  { %1859 = vmatprep.subr.bf16.mxu1 %v2488_v0  ;;  %v2047_v19 = vld [vmem:[#allocation2 + $0x48] sm:$0xff]   ;;  %v2048_v21 = vld [vmem:[#allocation2 + $0x40] sm:$0xff]  }
 0x4b5   :  { %vm766_vm2 = vcmp.lt.s32.totalorder %v2643_v24, 16 }
 0x4b7   :  { %1860 = vmatpush3.bf16.msra.mxu1 %v2042_v14 }
 0x4b8   :  { %1861 = vmatprep.subr.bf16.mxu1 %v2488_v0 }
 0x4bb   :  { %1862 = vmatpush3.bf16.msra.mxu1 %v2043_v15 }
 0x4bc   :  { %1863 = vmatprep.subr.bf16.mxu1 %v2488_v0 }
 0x4bf   :  { %1864 = vmatpush3.bf16.msra.mxu1 %v2044_v16 }
 0x4c0   :  { %1865 = vmatprep.subr.bf16.mxu1 %v2488_v0 }
 0x4c3   :  { %1866 = vmatpush3.bf16.msra.mxu1 %v2045_v17 }
 0x4c4   :  { %1867 = vmatprep.subr.bf16.mxu1 %v2488_v0 }
 0x4c7   :  { %1868 = vmatpush3.bf16.msra.mxu1 %v2046_v18 }
 0x4c8   :  { %1869 = vmatprep.subr.bf16.mxu1 %v2488_v0 }
 0x4cb   :  { %1870 = vmatpush3.bf16.msra.mxu1 %v2047_v19 }
 0x4cc   :  { %1871 = vmatprep.subr.bf16.mxu1 %v2488_v0 }
 0x4cf   :  { %1872 = vmatpush3.bf16.msra.mxu1 %v2048_v21 }
 0x4d2   :  { %1874 = vmatmul.mubr.bf16.vlgmr.msra.gmra.mxu1 %v670_v22 }
 0x592   :  { %v758_v26 = vpop.f32.mrf.mxu1 }
 0x593   :  { %v759_v27 = vadd.f32 %v1603_v25, %v758_v26 }
 0x594   :  { %v1875_v28 = vpop.f32.mrf.mxu1 }
 0x595   :  { %v767_v29 = vsel %vm766_vm2, %v759_v27, -inf }
 0x596   :  { %768 = vmax.xlane.f32.xlu0 %v767_v29  ;;  %v761_v30 = vpop.f32.mrf.mxu1 }
 0x598   :  { %v1876_v31 = vpop.f32.mrf.mxu1 }
 0x61f   :  { %v769_v32 = vpop.xlane.xlu0 %768 }
 0x620   :  { %v770_v33 = vsub.f32 %v767_v29, %v769_v32 }
 0x622   :  { %v771_v34 = vmul.f32 1.442695, %v770_v33 }
 0x624   :  { %2049 = vpow2.f32 %v771_v34 }
 0x631   :  { %v2050_v35 = vpop.eup %2049 }
 0x632   :  { %773 = vadd.xlane.f32.xlu0 %v2050_v35 }
 0x6bb   :  { %v774_v36 = vpop.xlane.xlu0 %773 }
 0x6bc   :  { %2051 = vrcp.f32 %v774_v36 }
 0x6c9   :  { %v2052_v37 = vpop.eup %2051 }
 0x6ca   :  { %v2648_v38 = vmul.f32 %v2052_v37, %v2050_v35 }
 0x6cb   :  { %2466 = dma.done.wait [#allocation3], 1024 }
 0x6cc   :  { %2467 = vsyncadd [#allocation3], 4294966272  ;;  %s779_s30 = scalar_lea.hbm %s2759_s1, 7168 }
 0x6cd   :  { %2316 = shalt.err (!%p2552_p5)  }
 0x6ce   :  { %790 = dma.hbm_to_vmem [thread:$0]  %s779_s30, 1024, %s2546_s10, [#allocation3 + $0x1] }
 0x6cf   :  { %v2656_v39 = vld [vmem:[#allocation2] sm:$0xf]  ;;  %v2658_v40 = vld [vmem:[#allocation2 + $0x4] sm:$0xf]  ;;  %v793_v41 = vld [vmem:[#allocation2 + $0x8] sm:$0xf] }
 0x6d0   :  { %v794_v42 = vld [vmem:[#allocation2 + $0xc] sm:$0xf]  ;;  %v795_v43 = vld [vmem:[#allocation2 + $0x10] sm:$0xf]  ;;  %v796_v44 = vld [vmem:[#allocation2 + $0x14] sm:$0xf] }
 0x6d1   :  { %v797_v45 = vld [vmem:[#allocation2 + $0x18] sm:$0xf]  ;;  %v798_v46 = vld [vmem:[#allocation2 + $0x1c] sm:$0xf]  ;;  %v799_v47 = vld [vmem:[#allocation2 + $0x20] sm:$0xf] }
 0x6d2   :  { %v800_v48 = vld [vmem:[#allocation2 + $0x24] sm:$0xf]  ;;  %v801_v49 = vld [vmem:[#allocation2 + $0x28] sm:$0xf]  ;;  %v802_v50 = vld [vmem:[#allocation2 + $0x2c] sm:$0xf] }
 0x6d3   :  { %v803_v51 = vld [vmem:[#allocation2 + $0x30] sm:$0xf]  ;;  %v804_v52 = vld [vmem:[#allocation2 + $0x34] sm:$0xf]  ;;  %v805_v53 = vld [vmem:[#allocation2 + $0x38] sm:$0xf] }
 0x6d4   :  { %v806_v54 = vld [vmem:[#allocation2 + $0x3c] sm:$0xf] }
 0x6d5   :  { %2468 = dma.done.wait [#allocation3 + $0x1], 1024 }
 0x6d6   :  { %2469 = vsyncadd [#allocation3 + $0x1], 4294966272  ;;  %s809_s7 = scalar_lea.hbm %s2759_s1, 8192  ;;  %1897 = vmatprep.subr.bf16.mxu1 %v2488_v0  ;;  %v1627_v55 = vcombine.low %v805_v53, %v806_v54  ;;  %1877 = vmatprep.subr.bf16.mxu0 %v2488_v0 }
 0x6d7   :  { %2339 = shalt.err (!%p2530_p0)  }
 0x6d8   :  { %820 = dma.hbm_to_vmem [thread:$0]  %s809_s7, 1024, %s2523_s28, [#allocation3]  ;;  %1913 = vmatprep.mubr.msk.bf16.mxu1 %vm2489_vm0, %v2488_v0  ;;  %1898 = vmatpush3.bf16.msra.mxu1 %v1627_v55  ;;  %v1626_v56 = vcombine.low %v803_v51, %v804_v52  ;;  %v1625_v57 = vcombine.low %v801_v49, %v802_v50  ;;  %v1624_v60 = vcombine.low %v799_v47, %v800_v48  ;;  %v1628_v14 = vld [vmem:[#allocation7 + $0x6] ss:$0 sm:$0xff] }
 0x6d9   :  { %1893 = vmatprep.mubr.msk.bf16.mxu0 %vm2489_vm0, %v2488_v0  ;;  %1899 = vmatprep.subr.bf16.mxu1 %v2488_v0  ;;  %v2053_v58 = vld [vmem:[#allocation2 + $0x78] sm:$0xff]   ;;  %v2054_v59 = vld [vmem:[#allocation2 + $0x70] sm:$0xff]   ;;  %v2055_v61 = vld [vmem:[#allocation2 + $0x68] sm:$0xff]   ;;  %v1623_v62 = vcombine.low %v797_v45, %v798_v46  ;;  %v1622_v1 = vcombine.low %v795_v43, %v796_v44  ;;  %v1621_v3 = vcombine.low %v793_v41, %v794_v42 }
 0x6da   :  { %1878 = vmatpush3.bf16.msra.mxu0 %v2053_v58  ;;  %v2056_v63 = vld [vmem:[#allocation2 + $0x60] sm:$0xff]   ;;  %v2057_v2 = vld [vmem:[#allocation2 + $0x58] sm:$0xff]   ;;  %v2058_v4 = vld [vmem:[#allocation2 + $0x50] sm:$0xff]   ;;  %v1620_v5 = vcombine.low %v2656_v39, %v2658_v40  ;;  %v837_v8 = vpack.c.bf16 %v2648_v38, %v2648_v38 }
 0x6db   :  { %1879 = vmatprep.subr.bf16.mxu0 %v2488_v0  ;;  %v2059_v6 = vld [vmem:[#allocation2 + $0x48] sm:$0xff]   ;;  %v2060_v7 = vld [vmem:[#allocation2 + $0x40] sm:$0xff]  }
 0x6dc   :  { %1900 = vmatpush3.bf16.msra.mxu1 %v1626_v56 }
 0x6dd   :  { %1901 = vmatprep.subr.bf16.mxu1 %v2488_v0 }
 0x6de   :  { %1880 = vmatpush3.bf16.msra.mxu0 %v2054_v59 }
 0x6df   :  { %1881 = vmatprep.subr.bf16.mxu0 %v2488_v0 }
 0x6e0   :  { %1902 = vmatpush3.bf16.msra.mxu1 %v1625_v57 }
 0x6e1   :  { %1903 = vmatprep.subr.bf16.mxu1 %v2488_v0 }
 0x6e2   :  { %1882 = vmatpush3.bf16.msra.mxu0 %v2055_v61 }
 0x6e3   :  { %1883 = vmatprep.subr.bf16.mxu0 %v2488_v0 }
 0x6e4   :  { %1904 = vmatpush3.bf16.msra.mxu1 %v1624_v60 }
 0x6e5   :  { %1905 = vmatprep.subr.bf16.mxu1 %v2488_v0 }
 0x6e6   :  { %1884 = vmatpush3.bf16.msra.mxu0 %v2056_v63 }
 0x6e7   :  { %1885 = vmatprep.subr.bf16.mxu0 %v2488_v0 }
 0x6e8   :  { %1906 = vmatpush3.bf16.msra.mxu1 %v1623_v62 }
 0x6e9   :  { %1907 = vmatprep.subr.bf16.mxu1 %v2488_v0 }
 0x6ea   :  { %1886 = vmatpush3.bf16.msra.mxu0 %v2057_v2 }
 0x6eb   :  { %1887 = vmatprep.subr.bf16.mxu0 %v2488_v0 }
 0x6ec   :  { %1908 = vmatpush3.bf16.msra.mxu1 %v1622_v1 }
 0x6ed   :  { %1909 = vmatprep.subr.bf16.mxu1 %v2488_v0 }
 0x6ee   :  { %1888 = vmatpush3.bf16.msra.mxu0 %v2058_v4 }
 0x6ef   :  { %1889 = vmatprep.subr.bf16.mxu0 %v2488_v0 }
 0x6f0   :  { %1910 = vmatpush3.bf16.msra.mxu1 %v1621_v3 }
 0x6f1   :  { %1911 = vmatprep.subr.bf16.mxu1 %v2488_v0 }
 0x6f2   :  { %1890 = vmatpush3.bf16.msra.mxu0 %v2059_v6 }
 0x6f3   :  { %1891 = vmatprep.subr.bf16.mxu0 %v2488_v0 }
 0x6f4   :  { %1912 = vmatpush3.bf16.msra.mxu1 %v1620_v5 }
 0x6f6   :  { %1892 = vmatpush3.bf16.msra.mxu0 %v2060_v7 }
 0x6f7   :  { %1914 = vmatmul.mubr.bf16.vlgmr.msra.gmra.mxu1 %v2576_v20 }
 0x6f9   :  { %1894 = vmatmul.mubr.bf16.vlgmr.msra.gmra.mxu0 %v837_v8 }
 0x7b7   :  { %v1008_v9 = vpop.f32.mrf.mxu1 }
 0x7b9   :  { %v1915_v10 = vpop.f32.mrf.mxu1  ;;  %v920_v13 = vpop.f32.mrf.mxu0 }
 0x7ba   :  { %v1009_v15 = vadd.f32 %v1008_v9, %v920_v13 }
 0x7bb   :  { %v1011_v11 = vpop.f32.mrf.mxu1  ;;  %v1895_v16 = vpop.f32.mrf.mxu0 }
 0x7bc   :  { %v1019_v17 = vadd.f32 %v1628_v14, %v1009_v15 }
 0x7bd   :  { %v1916_v12 = vpop.f32.mrf.mxu1  ;;  %v923_v18 = vpop.f32.mrf.mxu0 }
 0x7be   :  { %v1020_v20 = vmax.f32 %v1019_v17, 0.0 }
 0x7bf   :  { %v1896_v19 = vpop.f32.mrf.mxu0 }
 0x7c0   :  { %2470 = dma.done.wait [#allocation3], 1024 }
 0x7c1   :  { %2471 = vsyncadd [#allocation3], 4294966272  ;;  %s1023_s11 = scalar_lea.hbm %s2759_s1, 9216  ;;  %1917 = vmatprep.subr.bf16.mxu0 %v2488_v0  ;;  %1933 = vmatprep.mubr.msk.bf16.mxu0 %vm2489_vm0, %v2488_v0 }
 0x7c2   :  { %2362 = shalt.err (!%p2552_p5)  }
 0x7c3   :  { %1034 = dma.hbm_to_vmem [thread:$0]  %s1023_s11, 1024, %s2546_s10, [#allocation3 + $0x1]  ;;  %v1051_v30 = vpack.c.bf16 %v1020_v20, %v1020_v20  ;;  %v1629_v31 = vld [vmem:[#allocation7 + $0x7] ss:$0 sm:$0xff] }
 0x7c4   :  { %v2061_v21 = vld [vmem:[#allocation2 + $0x38] sm:$0xff]   ;;  %v2062_v22 = vld [vmem:[#allocation2 + $0x30] sm:$0xff]   ;;  %v2063_v23 = vld [vmem:[#allocation2 + $0x28] sm:$0xff]  }
 0x7c5   :  { %1918 = vmatpush3.bf16.msra.mxu0 %v2061_v21  ;;  %v2064_v25 = vld [vmem:[#allocation2 + $0x20] sm:$0xff]   ;;  %v2065_v26 = vld [vmem:[#allocation2 + $0x18] sm:$0xff]   ;;  %v2066_v27 = vld [vmem:[#allocation2 + $0x10] sm:$0xff]  }
 0x7c6   :  { %1919 = vmatprep.subr.bf16.mxu0 %v2488_v0  ;;  %v2067_v28 = vld [vmem:[#allocation2 + $0x8] sm:$0xff]   ;;  %v2068_v29 = vld [vmem:[#allocation2] sm:$0xff]  }
 0x7c9   :  { %1920 = vmatpush3.bf16.msra.mxu0 %v2062_v22 }
 0x7ca   :  { %1921 = vmatprep.subr.bf16.mxu0 %v2488_v0 }
 0x7cd   :  { %1922 = vmatpush3.bf16.msra.mxu0 %v2063_v23 }
 0x7ce   :  { %1923 = vmatprep.subr.bf16.mxu0 %v2488_v0 }
 0x7d1   :  { %1924 = vmatpush3.bf16.msra.mxu0 %v2064_v25 }
 0x7d2   :  { %1925 = vmatprep.subr.bf16.mxu0 %v2488_v0 }
 0x7d5   :  { %1926 = vmatpush3.bf16.msra.mxu0 %v2065_v26 }
 0x7d6   :  { %1927 = vmatprep.subr.bf16.mxu0 %v2488_v0 }
 0x7d9   :  { %1928 = vmatpush3.bf16.msra.mxu0 %v2066_v27 }
 0x7da   :  { %1929 = vmatprep.subr.bf16.mxu0 %v2488_v0 }
 0x7dd   :  { %1930 = vmatpush3.bf16.msra.mxu0 %v2067_v28 }
 0x7de   :  { %1931 = vmatprep.subr.bf16.mxu0 %v2488_v0 }
 0x7e1   :  { %1932 = vmatpush3.bf16.msra.mxu0 %v2068_v29 }
 0x7e4   :  { %1934 = vmatmul.mubr.bf16.vlgmr.msra.gmra.mxu0 %v1051_v30 }
 0x8a4   :  { %v1139_v32 = vpop.f32.mrf.mxu0 }
 0x8a5   :  { %v1140_v33 = vadd.f32 %v1629_v31, %v1139_v32 }
 0x8a6   :  { %v1935_v34 = vpop.f32.mrf.mxu0 }
 0x8a7   :  { %v1145_v35 = vmax.f32 %v1140_v33, 0.0 }
 0x8a8   :  { %v1142_v36 = vpop.f32.mrf.mxu0 }
 0x8aa   :  { %v1936_v37 = vpop.f32.mrf.mxu0 }
 0x8ab   :  { %2472 = dma.done.wait [#allocation3 + $0x1], 1024 }
 0x8ac   :  { %2473 = vsyncadd [#allocation3 + $0x1], 4294966272  ;;  %s1148_s15 = scalar_lea.hbm %s2759_s1, 10240  ;;  %1937 = vmatprep.subr.bf16.mxu1 %v2488_v0  ;;  %1953 = vmatprep.mubr.msk.bf16.mxu1 %vm2489_vm0, %v2488_v0 }
 0x8ad   :  { %2385 = shalt.err (!%p2530_p0)  }
 0x8ae   :  { %1159 = dma.hbm_to_vmem [thread:$0]  %s1148_s15, 1024, %s2523_s28, [#allocation3]  ;;  %v1176_v47 = vpack.c.bf16 %v1145_v35, %v1145_v35  ;;  %v1638_v48 = vld [vmem:[#allocation7 + $0x8] ss:$0 sm:$0xff] }
 0x8af   :  { %v2069_v39 = vld [vmem:[#allocation2 + $0x78] sm:$0xff]   ;;  %v2070_v40 = vld [vmem:[#allocation2 + $0x70] sm:$0xff]   ;;  %v2071_v41 = vld [vmem:[#allocation2 + $0x68] sm:$0xff]  }
 0x8b0   :  { %1938 = vmatpush3.bf16.msra.mxu1 %v2069_v39  ;;  %v2072_v42 = vld [vmem:[#allocation2 + $0x60] sm:$0xff]   ;;  %v2073_v43 = vld [vmem:[#allocation2 + $0x58] sm:$0xff]   ;;  %v2074_v44 = vld [vmem:[#allocation2 + $0x50] sm:$0xff]  }
 0x8b1   :  { %1939 = vmatprep.subr.bf16.mxu1 %v2488_v0  ;;  %v2075_v45 = vld [vmem:[#allocation2 + $0x48] sm:$0xff]   ;;  %v2076_v46 = vld [vmem:[#allocation2 + $0x40] sm:$0xff]  }
 0x8b4   :  { %1940 = vmatpush3.bf16.msra.mxu1 %v2070_v40 }
 0x8b5   :  { %1941 = vmatprep.subr.bf16.mxu1 %v2488_v0 }
 0x8b8   :  { %1942 = vmatpush3.bf16.msra.mxu1 %v2071_v41 }
 0x8b9   :  { %1943 = vmatprep.subr.bf16.mxu1 %v2488_v0 }
 0x8bc   :  { %1944 = vmatpush3.bf16.msra.mxu1 %v2072_v42 }
 0x8bd   :  { %1945 = vmatprep.subr.bf16.mxu1 %v2488_v0 }
 0x8c0   :  { %1946 = vmatpush3.bf16.msra.mxu1 %v2073_v43 }
 0x8c1   :  { %1947 = vmatprep.subr.bf16.mxu1 %v2488_v0 }
 0x8c4   :  { %1948 = vmatpush3.bf16.msra.mxu1 %v2074_v44 }
 0x8c5   :  { %1949 = vmatprep.subr.bf16.mxu1 %v2488_v0 }
 0x8c8   :  { %1950 = vmatpush3.bf16.msra.mxu1 %v2075_v45 }
 0x8c9   :  { %1951 = vmatprep.subr.bf16.mxu1 %v2488_v0 }
 0x8cc   :  { %1952 = vmatpush3.bf16.msra.mxu1 %v2076_v46 }
 0x8cf   :  { %1954 = vmatmul.mubr.bf16.vlgmr.msra.gmra.mxu1 %v1176_v47 }
 0x98f   :  { %v1264_v49 = vpop.f32.mrf.mxu1 }
 0x990   :  { %v1265_v50 = vadd.f32 %v1638_v48, %v1264_v49 }
 0x991   :  { %v1955_v51 = vpop.f32.mrf.mxu1 }
 0x992   :  { %v1270_v52 = vmax.f32 %v1265_v50, 0.0 }
 0x993   :  { %v1267_v53 = vpop.f32.mrf.mxu1 }
 0x995   :  { %v1956_v54 = vpop.f32.mrf.mxu1 }
 0x996   :  { %2474 = dma.done.wait [#allocation3], 1024 }
 0x997   :  { %2475 = vsyncadd [#allocation3], 4294966272  ;;  %s1273_s16 = scalar_lea.hbm %s2759_s1, 11264  ;;  %1957 = vmatprep.subr.bf16.mxu0 %v2488_v0  ;;  %1973 = vmatprep.mubr.msk.bf16.mxu0 %vm2489_vm0, %v2488_v0 }
 0x998   :  { %2408 = shalt.err (!%p2552_p5)  }
 0x999   :  { %1284 = dma.hbm_to_vmem [thread:$0]  %s1273_s16, 1024, %s2546_s10, [#allocation3 + $0x1]  ;;  %v1301_v63 = vpack.c.bf16 %v1270_v52, %v1270_v52  ;;  %v1647_v1 = vld [vmem:[#allocation7 + $0x9] ss:$0 sm:$0xff] }
 0x99a   :  { %v2077_v55 = vld [vmem:[#allocation2 + $0x38] sm:$0xff]   ;;  %v2078_v56 = vld [vmem:[#allocation2 + $0x30] sm:$0xff]   ;;  %v2079_v57 = vld [vmem:[#allocation2 + $0x28] sm:$0xff]  }
 0x99b   :  { %1958 = vmatpush3.bf16.msra.mxu0 %v2077_v55  ;;  %v2080_v58 = vld [vmem:[#allocation2 + $0x20] sm:$0xff]   ;;  %v2081_v59 = vld [vmem:[#allocation2 + $0x18] sm:$0xff]   ;;  %v2082_v60 = vld [vmem:[#allocation2 + $0x10] sm:$0xff]  }
 0x99c   :  { %1959 = vmatprep.subr.bf16.mxu0 %v2488_v0  ;;  %v2083_v61 = vld [vmem:[#allocation2 + $0x8] sm:$0xff]   ;;  %v2084_v62 = vld [vmem:[#allocation2] sm:$0xff]  }
 0x99f   :  { %1960 = vmatpush3.bf16.msra.mxu0 %v2078_v56 }
 0x9a0   :  { %1961 = vmatprep.subr.bf16.mxu0 %v2488_v0 }
 0x9a3   :  { %1962 = vmatpush3.bf16.msra.mxu0 %v2079_v57 }
 0x9a4   :  { %1963 = vmatprep.subr.bf16.mxu0 %v2488_v0 }
 0x9a7   :  { %1964 = vmatpush3.bf16.msra.mxu0 %v2080_v58 }
 0x9a8   :  { %1965 = vmatprep.subr.bf16.mxu0 %v2488_v0 }
 0x9ab   :  { %1966 = vmatpush3.bf16.msra.mxu0 %v2081_v59 }
 0x9ac   :  { %1967 = vmatprep.subr.bf16.mxu0 %v2488_v0 }
 0x9af   :  { %1968 = vmatpush3.bf16.msra.mxu0 %v2082_v60 }
 0x9b0   :  { %1969 = vmatprep.subr.bf16.mxu0 %v2488_v0 }
 0x9b3   :  { %1970 = vmatpush3.bf16.msra.mxu0 %v2083_v61 }
 0x9b4   :  { %1971 = vmatprep.subr.bf16.mxu0 %v2488_v0 }
 0x9b7   :  { %1972 = vmatpush3.bf16.msra.mxu0 %v2084_v62 }
 0x9ba   :  { %1974 = vmatmul.mubr.bf16.vlgmr.msra.gmra.mxu0 %v1301_v63 }
 0xa7a   :  { %v1389_v2 = vpop.f32.mrf.mxu0 }
 0xa7b   :  { %v1390_v3 = vadd.f32 %v1647_v1, %v1389_v2 }
 0xa7c   :  { %v1975_v4 = vpop.f32.mrf.mxu0 }
 0xa7d   :  { %v1395_v5 = vmax.f32 %v1390_v3, 0.0 }
 0xa7e   :  { %v1392_v6 = vpop.f32.mrf.mxu0 }
 0xa80   :  { %v1976_v7 = vpop.f32.mrf.mxu0 }
 0xa81   :  { %2476 = dma.done.wait [#allocation3 + $0x1], 1024 }
 0xa82   :  { %2477 = vsyncadd [#allocation3 + $0x1], 4294966272  ;;  %1977 = vmatprep.subr.bf16.mxu1 %v2488_v0  ;;  %1993 = vmatprep.mubr.msk.bf16.mxu1 %vm2489_vm0, %v2488_v0  ;;  %1518 = vst [vmem:[#allocation9] sm:$0xff] %v2648_v38  ;;  %v2085_v8 = vld [vmem:[#allocation2 + $0x78] sm:$0xff]   ;;  %v2086_v9 = vld [vmem:[#allocation2 + $0x70] sm:$0xff]   ;;  %v1414_v15 = vpack.c.bf16 %v1395_v5, %v1395_v5  ;;  %s2490_s1 = smov [#allocation9]  }
 0xa83   :  { %1978 = vmatpush3.bf16.msra.mxu1 %v2085_v8  ;;  %v2087_v10 = vld [vmem:[#allocation2 + $0x68] sm:$0xff]   ;;  %v2088_v11 = vld [vmem:[#allocation2 + $0x60] sm:$0xff]   ;;  %v2089_v12 = vld [vmem:[#allocation2 + $0x58] sm:$0xff]   ;;  %s1526_s10 = sshll.u32 %s2490_s1, 4  ;;  %s1527_s10 = int_to_ptr.vmem [resolvable:$true] %s1526_s10 }
 0xa84   :  { %1979 = vmatprep.subr.bf16.mxu1 %v2488_v0  ;;  %v2090_v13 = vld [vmem:[#allocation2 + $0x50] sm:$0xff]   ;;  %v2091_v38 = vld [vmem:[#allocation2 + $0x48] sm:$0xff]   ;;  %v2092_v14 = vld [vmem:[#allocation2 + $0x40] sm:$0xff]   ;;  %s2410_s12 = scalar_lea.vmem %s1527_s10, 128  ;;  %p2415_p7 = scmp.lt.s32.totalorder %s1527_s10, %s1527_s10 }
 0xa85   :  { %v1656_v16 = vld [vmem:[#allocation7 + $0xa] ss:$0 sm:$0xff]  ;;  %p2411_p6 = scmp.ne.s32.totalorder %s1527_s10, %s2410_s12  ;;  %p2416_p8 = scmp.lt.s32.totalorder %s2410_s12, %s2410_s12 }
 0xa87   :  { %1980 = vmatpush3.bf16.msra.mxu1 %v2086_v9  ;;  %p2417_p9 = por %p2416_p8, %p2415_p7 }
 0xa88   :  { %1981 = vmatprep.subr.bf16.mxu1 %v2488_v0 }
 0xa89   :  { %p2418_p10 = pnand %p2417_p9, %p2411_p6 }
 0xa8b   :  { %1982 = vmatpush3.bf16.msra.mxu1 %v2087_v10 }
 0xa8c   :  { %1983 = vmatprep.subr.bf16.mxu1 %v2488_v0 }
 0xa8f   :  { %1984 = vmatpush3.bf16.msra.mxu1 %v2088_v11 }
 0xa90   :  { %1985 = vmatprep.subr.bf16.mxu1 %v2488_v0 }
 0xa93   :  { %1986 = vmatpush3.bf16.msra.mxu1 %v2089_v12 }
 0xa94   :  { %1987 = vmatprep.subr.bf16.mxu1 %v2488_v0 }
 0xa97   :  { %1988 = vmatpush3.bf16.msra.mxu1 %v2090_v13 }
 0xa98   :  { %1989 = vmatprep.subr.bf16.mxu1 %v2488_v0 }
 0xa9b   :  { %1990 = vmatpush3.bf16.msra.mxu1 %v2091_v38 }
 0xa9c   :  { %1991 = vmatprep.subr.bf16.mxu1 %v2488_v0 }
 0xa9f   :  { %1992 = vmatpush3.bf16.msra.mxu1 %v2092_v14 }
 0xaa2   :  { %1994 = vmatmul.mubr.bf16.vlgmr.msra.gmra.mxu1 %v1414_v15 }
 0xb62   :  { %v1502_v17 = vpop.f32.mrf.mxu1 }
 0xb63   :  { %v1503_v18 = vadd.f32 %v1656_v16, %v1502_v17 }
 0xb64   :  { %v1995_v20 = vpop.f32.mrf.mxu1 }
 0xb65   :  { %v1508_v19 = vsel %vm766_vm2, %v1503_v18, -inf }
 0xb66   :  { %1509 = vmax.xlane.f32.xlu0 %v1508_v19  ;;  %v1505_v21 = vpop.f32.mrf.mxu1 }
 0xb68   :  { %v1996_v22 = vpop.f32.mrf.mxu1 }
 0xbef   :  { %v1510_v23 = vpop.xlane.xlu0 %1509 }
 0xbf0   :  { %v1511_v25 = vsub.f32 %v1508_v19, %v1510_v23 }
 0xbf2   :  { %v1512_v26 = vmul.f32 1.442695, %v1511_v25 }
 0xbf4   :  { %2093 = vpow2.f32 %v1512_v26 }
 0xc01   :  { %v2094_v27 = vpop.eup %2093 }
 0xc02   :  { %1514 = vadd.xlane.f32.xlu0 %v2094_v27 }
 0xc03   :  { %2421 = shalt.err (!%p2418_p10)
}
 0xc04   :  { %1529 = dma.vmem_to_hbm [thread:$0]  %s1527_s10, 128, %s2761_s3, [#allocation6]  }
 0xc05   :  { %s2491_s19 = smov [#allocation10]  }
 0xc06   :  { %s1536_s20 = sshll.u32 %s2491_s19, 4  ;;  %s1537_s20 = int_to_ptr.vmem [resolvable:$true] %s1536_s20 }
 0xc07   :  { %s2430_s21 = scalar_lea.vmem %s1537_s20, 128  ;;  %p2435_p12 = scmp.lt.s32.totalorder %s1537_s20, %s1537_s20 }
 0xc08   :  { %p2431_p11 = scmp.ne.s32.totalorder %s1537_s20, %s2430_s21  ;;  %p2436_p13 = scmp.lt.s32.totalorder %s2430_s21, %s2430_s21 }
 0xc0a   :  { %p2437_p0 = por %p2436_p13, %p2435_p12 }
 0xc0c   :  { %p2438_p1 = pnand %p2437_p0, %p2431_p11 }
 0xc8b   :  { %v1515_v0 = vpop.xlane.xlu0 %1514 }
 0xc8c   :  { %2095 = vrcp.f32 %v1515_v0 }
 0xc99   :  { %v2096_v24 = vpop.eup %2095 }
 0xc9a   :  { %v1517_v28 = vmul.f32 %v2096_v24, %v2094_v27 }
 0xc9c   :  { %1519 = vst [vmem:[#allocation10] sm:$0xff] %v1517_v28 }
 0xc9d   :  { %2441 = shalt.err (!%p2438_p1)
}
 0xc9e   :  { %1539 = dma.vmem_to_hbm [thread:$0]  %s1537_s20, 128, %s2762_s4, [#allocation11]  }
 0xc9f   :  { %2478 = dma.done.wait [#allocation6], 128  }
 0xca0   :  { %2479 = vsyncadd [#allocation6], 4294967168 }
 0xca1   :  { %2480 = dma.done.wait [#allocation11], 128  }
 0xca2   :  { %2481 = vsyncadd [#allocation11], 4294967168 }
 0xca3   :  { %1546 = vsyncpa [#allocation5], 1 }
 0xca4   :  { %1547 = vsyncpa [#allocation8], 1 }
 0xca5   :  { %1548 = vsyncpa [#allocation6], 1 }
 0xca6   :  { %1549 = vsyncpa [#allocation11], 1 }
 0xca7   :  { %1550 = vsyncmov [#allocation3] }
 0xcaa   :  { %s1551_s3 = vpop.sfrf %1550 }
 0xcab   :  { %p1665_p2 = scmp.ne.s32.totalorder %s1551_s3, 0 }
 0xcad   :  { %1555 = shalt.err (%p1665_p2)  }
 0xcae   :  { %1557 = vsyncmov [#allocation3 + $0x1] }
 0xcb1   :  { %s1558_s24 = vpop.sfrf %1557 }
 0xcb2   :  { %p1666_p3 = scmp.ne.s32.totalorder %s1558_s24, 0 }
 0xcb4   :  { %1562 = shalt.err (%p1666_p3)  }

</bundles_post_ra>
